<compile_context>
chip_gen: v7x
topology: tpu7x:2x2x1
jax: 0.10.0
libtpu: 0.0.40
codegen_flags: <defaults>
</compile_context>

<pallas_src>
import jax
import jax.numpy as jnp
import numpy as np
from jax.experimental import pallas as pl
from jax.experimental.pallas import tpu as pltpu

NEG_SLOPE = 0.01  # nn.LeakyReLU default negative_slope


# ----------------------------- Pallas kernel ------------------------------- #
def botrgcn_kernel(
    x_ref, adj_ref,
    wmod_ref, bmod_ref, wi_ref, bi_ref, alpha_ref,
    w1all_ref, b1_ref,
    w2all_ref, b2_ref,
    wcls_ref, bcls_ref,
    out_ref,
):
    f32 = jnp.float32
    bf16 = jnp.bfloat16
    N, H = out_ref.shape
    R = adj_ref.shape[0]  # static

    def mm(a_bf16, b_bf16):
        # bf16 operands, f32 accumulation on the MXU.
        return jnp.dot(a_bf16, b_bf16, preferred_element_type=f32)

    def lrelu(v):
        return jnp.where(v > 0, v, NEG_SLOPE * v)

    # Fused per-modality Linear + LeakyReLU:
    # x_pad[N,128] @ block-diag W[128,128] == cat(des@Wd, tweet@Wt, prop@Wn, cat@Wc)
    mod = lrelu(mm(x_ref[...], wmod_ref[...]) + bmod_ref[...])        # [N, input_dim] f32

    # linear_relu_input: single Linear(input_dim, H) + PReLU(H) (per-channel slope)
    h = mm(mod.astype(bf16), wi_ref[...]) + bi_ref[...]
    h = jnp.where(h > 0, h, alpha_ref[...] * h)                       # [N, H], f32

    def rgcn(hin_f32, wall_ref, b_ref):
        # Cast the layer input to bf16 once (hoisted; reused by the single
        # root-folded transform matmul).
        hin = hin_f32.astype(bf16)
        # One (R+1)*H-lane matmul: [root | rel_0 | ... | rel_{R-1}] weights.
        msg = mm(hin, wall_ref[...])                                  # [N, (R+1)*H] f32
        acc = msg[:, :H] + b_ref[...]                                 # root + bias
        # Per-relation aggregation — slices at 128-lane boundaries are
        # layout-preserving; no restack copy.
        for r in range(R):
            m_r = msg[:, (r + 1) * H:(r + 2) * H].astype(bf16)        # [N, H]
            acc = acc + mm(adj_ref[r], m_r)                           # [N, H]
        return acc

    # RGCN layer 1 (F.dropout is identity in eval mode)
    h1 = rgcn(h, w1all_ref, b1_ref)
    # RGCN layer 2 (F.dropout is identity in eval mode)
    h2 = rgcn(h1, w2all_ref, b2_ref)

    # classifier: single Linear(H, H)
    out_ref[...] = mm(h2.astype(bf16), wcls_ref[...]) + bcls_ref[...]


# --------------------------- one-time operand prep -------------------------- #
def prepare_botrgcn_operands(params, adj, prop_num, tweet_num, cat_num, des_num):
    """One-time prep of all constant kernel operands (block-diagonal modality
    weight, root-folded relation weights, bf16 casts).  Call once; reuse the
    returned dict across forwards so only the raw feature slab is per-call work."""
    bf16 = jnp.bfloat16
    Q = params["wd"].shape[1]
    input_dim = 4 * Q
    P, T, C, D = prop_num, tweet_num, cat_num, des_num
    f_raw = P + T + C + D
    f_pad = -(-f_raw // 128) * 128  # lane-dense K for the modality matmul

    # Block-diagonal modality weight. Row blocks follow data.x column layout
    # [prop, tweet, cat, des]; column blocks follow torch.cat((d, t, n, c), dim=1).
    wmod = jnp.zeros((f_pad, input_dim), jnp.float32)
    wmod = wmod.at[P + T + C:f_raw, 0:Q].set(params["wd"])            # des   -> d
    wmod = wmod.at[P:P + T, Q:2 * Q].set(params["wt"])                # tweet -> t
    wmod = wmod.at[0:P, 2 * Q:3 * Q].set(params["wn"])                # prop  -> n
    wmod = wmod.at[P + T:P + T + C, 3 * Q:4 * Q].set(params["wc"])    # cat   -> c
    bmod = jnp.concatenate(
        [params["bd"], params["bt"], params["bn"], params["bc"]], axis=1)

    H = params["wr1"].shape[0]
    R = adj.shape[0]
    # Root-folded relation weights: [H, (R+1)*H] — root first, then relations.
    w1all = jnp.concatenate([params["wr1"]] + [params["w1"][r] for r in range(R)],
                            axis=1)
    w2all = jnp.concatenate([params["wr2"]] + [params["w2"][r] for r in range(R)],
                            axis=1)

    return dict(
        adj=adj.astype(bf16),                                         # [R, N, N]
        wmod=wmod.astype(bf16), bmod=bmod,
        wi=params["wi"].astype(bf16), bi=params["bi"], alpha=params["alpha"],
        w1all=w1all.astype(bf16), b1=params["b1"],
        w2all=w2all.astype(bf16), b2=params["b2"],
        wcls=params["wcls"].astype(bf16), bcls=params["bcls"],
        f_raw=f_raw, f_pad=f_pad, H=H, R=R, N=adj.shape[1],
    )


def _vmem_limit_bytes():
    """Per-generation VMEM budget (v5e/v6e: 128 MiB physical, v7x: 64 MiB)."""
    try:
        info = pltpu.get_tpu_info()
        cap = int(getattr(info, "vmem_capacity_bytes", 128 * 1024 * 1024))
        return max(32 * 1024 * 1024, min(cap // 2, 64 * 1024 * 1024))
    except Exception:
        return 32 * 1024 * 1024


# ------------------------------ forward wrapper ----------------------------- #
def make_botrgcn_forward(ops):
    """Builds a jitted forward closing over the prepared operands as constants.
    Per-call work: pad + bf16-cast the raw feature slab only."""
    f_raw, f_pad = ops["f_raw"], ops["f_pad"]
    N, H = ops["N"], ops["H"]
    const_args = (ops["adj"], ops["wmod"], ops["bmod"], ops["wi"], ops["bi"],
                  ops["alpha"], ops["w1all"], ops["b1"], ops["w2all"], ops["b2"],
                  ops["wcls"], ops["bcls"])
    vmem_limit = _vmem_limit_bytes()

    def _spec(shape):
        nd = len(shape)
        return pl.BlockSpec(shape, lambda i, nd=nd: (0,) * nd)

    @jax.jit
    def forward(x_raw):
        x = x_raw
        if f_pad > f_raw:
            x = jnp.pad(x, ((0, 0), (0, f_pad - f_raw)))
        x = x.astype(jnp.bfloat16)
        args = (x,) + const_args

        return pl.pallas_call(
            botrgcn_kernel,
            grid=(1,),
            in_specs=[_spec(a.shape) for a in args],
            out_specs=pl.BlockSpec((N, H), lambda i: (0, 0)),
            out_shape=jax.ShapeDtypeStruct((N, H), jnp.float32),
            compiler_params=pltpu.CompilerParams(
                dimension_semantics=("arbitrary",),
                vmem_limit_bytes=vmem_limit),
        )(*args)

    return forward


# --------------------------- pure-JAX references ---------------------------- #
def botrgcn_reference(num_prop, tweet, cat_prop, des, params, adj, use_bf16):
    """Unfused reference following the PyTorch forward.  use_bf16=True mirrors
    the kernel's bf16-operand / f32-accumulation numerics; False is full f32."""
    if use_bf16:
        def mm(a, b):
            return jnp.dot(a.astype(jnp.bfloat16), b.astype(jnp.bfloat16),
                           preferred_element_type=jnp.float32)
    else:
        prec = jax.lax.Precision.HIGHEST

        def mm(a, b):
            return jnp.dot(a, b, precision=prec)

    lrelu = lambda v: jnp.where(v > 0, v, NEG_SLOPE * v)

    d = lrelu(mm(des, params["wd"]) + params["bd"])
    t = lrelu(mm(tweet, params["wt"]) + params["bt"])
    n = lrelu(mm(num_prop, params["wn"]) + params["bn"])
    c = lrelu(mm(cat_prop, params["wc"]) + params["bc"])
    h = mm(jnp.concatenate([d, t, n, c], axis=1), params["wi"]) + params["bi"]
    h = jnp.where(h > 0, h, params["alpha"] * h)

    R = adj.shape[0]
    h1 = mm(h, params["wr1"]) + params["b1"]
    for r in range(R):
        h1 = h1 + mm(adj[r], mm(h, params["w1"][r]))
    h2 = mm(h1, params["wr2"]) + params["b2"]
    for r in range(R):
        h2 = h2 + mm(adj[r], mm(h1, params["w2"][r]))
    return mm(h2, params["wcls"]) + params["bcls"]


# ------------------------------ param init ---------------------------------- #
def _linear(key, fan_in, fan_out):
    kw, kb = jax.random.split(key)
    bound = 1.0 / np.sqrt(fan_in)
    w = jax.random.uniform(kw, (fan_in, fan_out), jnp.float32, -bound, bound)
    b = jax.random.uniform(kb, (1, fan_out), jnp.float32, -bound, bound)
    return w, b


def init_params(key, prop_num, tweet_num, cat_num, des_num, input_dim, hidden, R):
    Q = input_dim // 4
    keys = jax.random.split(key, 8)
    wd, bd = _linear(keys[0], des_num, Q)
    wt, bt = _linear(keys[1], tweet_num, Q)
    wn, bn = _linear(keys[2], prop_num, Q)
    wc, bc = _linear(keys[3], cat_num, Q)
    wi, bi = _linear(keys[4], input_dim, hidden)
    alpha = jnp.full((1, hidden), 0.25, jnp.float32)  # nn.PReLU(hidden) init

    def rgcn(k):
        k1, k2, k3 = jax.random.split(k, 3)
        bound = 1.0 / np.sqrt(hidden)
        w_rel = jax.random.uniform(k1, (R, hidden, hidden), jnp.float32, -bound, bound)
        w_root = jax.random.uniform(k2, (hidden, hidden), jnp.float32, -bound, bound)
        b = jax.random.uniform(k3, (1, hidden), jnp.float32, -bound, bound)
        return w_rel, w_root, b

    w1, wr1, b1 = rgcn(keys[5])
    w2, wr2, b2 = rgcn(keys[6])
    wcls, bcls = _linear(keys[7], hidden, hidden)

    return dict(wd=wd, bd=bd, wt=wt, bt=bt, wn=wn, bn=bn, wc=wc, bc=bc,
                wi=wi, bi=bi, alpha=alpha,
                w1=w1, wr1=wr1, b1=b1, w2=w2, wr2=wr2, b2=b2,
                wcls=wcls, bcls=bcls)


def build_dense_adjacency(edge_index, edge_type, num_nodes, num_relations):
    """Edge list -> mean-normalized dense adjacency [R, N, N] (A[r,dst,src])."""
    src, dst = edge_index[0], edge_index[1]
    adj = jnp.zeros((num_relations, num_nodes, num_nodes), jnp.float32)
    adj = adj.at[edge_type, dst, src].add(1.0)
    deg = adj.sum(axis=2, keepdims=True)
    return adj / jnp.maximum(deg, 1.0)


# --------------------------------- main ------------------------------------- #
if __name__ == "__main__":
    # args: prop_num=16, tweet_num=32, cat_num=16, des_num=32,
    #       input_dim=128, hidden_dim=128, num_relations=2, node_num=128
    N, R = 128, 2
    PROP, TWEET, CAT, DES = 16, 32, 16, 32
    INPUT_DIM, HIDDEN = 128, 128
    E = 512

    key = jax.random.PRNGKey(0)
    k_x, k_src, k_dst, k_et, k_p = jax.random.split(key, 5)

    # data.x : [N, prop + tweet + cat + des]  (same column ordering as forward())
    x = jax.random.normal(k_x, (N, PROP + TWEET + CAT + DES), jnp.float32)
    num_prop = x[:, :PROP]
    tweet = x[:, PROP:PROP + TWEET]
    cat_prop = x[:, PROP + TWEET:PROP + TWEET + CAT]
    des = x[:, PROP + TWEET + CAT:]

    edge_index = jnp.stack([
        jax.random.randint(k_src, (E,), 0, N),
        jax.random.randint(k_dst, (E,), 0, N),
    ])
    edge_type = jax.random.randint(k_et, (E,), 0, R)
    adj = build_dense_adjacency(edge_index, edge_type, N, R)

    params = init_params(k_p, PROP, TWEET, CAT, DES, INPUT_DIM, HIDDEN, R)

    # One-time operand prep + jitted forward closure (constants baked in).
    ops = prepare_botrgcn_operands(params, adj, PROP, TWEET, CAT, DES)
    forward = make_botrgcn_forward(ops)

    out = forward(x)
    out = jax.block_until_ready(out)
    out_np = np.asarray(out)

    # (1) Structural correctness: kernel vs unfused reference with matching
    #     bf16-operand / f32-accumulation numerics -> should agree tightly.
    ref_bf16 = botrgcn_reference(num_prop, tweet, cat_prop, des, params, adj,
                                 use_bf16=True)
    np.testing.assert_allclose(out_np, np.asarray(ref_bf16), rtol=1e-3, atol=1e-3)

    # (2) Sanity vs full-f32 reference (bf16 operand quantization drift allowed).
    ref_f32 = botrgcn_reference(num_prop, tweet, cat_prop, des, params, adj,
                                use_bf16=False)
    np.testing.assert_allclose(out_np, np.asarray(ref_f32), rtol=5e-2, atol=5e-2)

    print("KERNEL_OK")
</pallas_src>

<mosaic_0001>
module attributes {stable_mosaic.version = 11 : i64} {
  func.func @botrgcn_kernel(%arg0: i32, %arg1: memref<128x128xbf16, #tpu.memory_space<vmem>>, %arg2: memref<2x128x128xbf16, #tpu.memory_space<vmem>>, %arg3: memref<128x128xbf16, #tpu.memory_space<vmem>>, %arg4: memref<1x128xf32, #tpu.memory_space<vmem>>, %arg5: memref<128x128xbf16, #tpu.memory_space<vmem>>, %arg6: memref<1x128xf32, #tpu.memory_space<vmem>>, %arg7: memref<1x128xf32, #tpu.memory_space<vmem>>, %arg8: memref<128x384xbf16, #tpu.memory_space<vmem>>, %arg9: memref<1x128xf32, #tpu.memory_space<vmem>>, %arg10: memref<128x384xbf16, #tpu.memory_space<vmem>>, %arg11: memref<1x128xf32, #tpu.memory_space<vmem>>, %arg12: memref<128x128xbf16, #tpu.memory_space<vmem>>, %arg13: memref<1x128xf32, #tpu.memory_space<vmem>>, %arg14: memref<128x128xf32, #tpu.memory_space<vmem>>) attributes {dimension_semantics = [#tpu.dimension_semantics<arbitrary>], iteration_bounds = array<i64: 1>, scalar_prefetch = 0 : i64, scratch_operands = 0 : i64, tpu.core_type = #tpu.core_type<tc>, window_params = [{pipeline_mode = #tpu.pipeline_mode<synchronous>, transform_indices = @transform_0, window_bounds = array<i64: 128, 128>}, {pipeline_mode = #tpu.pipeline_mode<synchronous>, transform_indices = @transform_1, window_bounds = array<i64: 2, 128, 128>}, {pipeline_mode = #tpu.pipeline_mode<synchronous>, transform_indices = @transform_2, window_bounds = array<i64: 128, 128>}, {pipeline_mode = #tpu.pipeline_mode<synchronous>, transform_indices = @transform_3, window_bounds = array<i64: 1, 128>}, {pipeline_mode = #tpu.pipeline_mode<synchronous>, transform_indices = @transform_4, window_bounds = array<i64: 128, 128>}, {pipeline_mode = #tpu.pipeline_mode<synchronous>, transform_indices = @transform_5, window_bounds = array<i64: 1, 128>}, {pipeline_mode = #tpu.pipeline_mode<synchronous>, transform_indices = @transform_6, window_bounds = array<i64: 1, 128>}, {pipeline_mode = #tpu.pipeline_mode<synchronous>, transform_indices = @transform_7, window_bounds = array<i64: 128, 384>}, {pipeline_mode = #tpu.pipeline_mode<synchronous>, transform_indices = @transform_8, window_bounds = array<i64: 1, 128>}, {pipeline_mode = #tpu.pipeline_mode<synchronous>, transform_indices = @transform_9, window_bounds = array<i64: 128, 384>}, {pipeline_mode = #tpu.pipeline_mode<synchronous>, transform_indices = @transform_10, window_bounds = array<i64: 1, 128>}, {pipeline_mode = #tpu.pipeline_mode<synchronous>, transform_indices = @transform_11, window_bounds = array<i64: 128, 128>}, {pipeline_mode = #tpu.pipeline_mode<synchronous>, transform_indices = @transform_12, window_bounds = array<i64: 1, 128>}, {pipeline_mode = #tpu.pipeline_mode<synchronous>, transform_indices = @transform_13, window_bounds = array<i64: 128, 128>}]} {
    %c0 = arith.constant 0 : index
    %c0_0 = arith.constant 0 : index
    %0 = vector.load %arg1[%c0, %c0_0] : memref<128x128xbf16, #tpu.memory_space<vmem>>, vector<128x128xbf16>
    %c0_1 = arith.constant 0 : index
    %c0_2 = arith.constant 0 : index
    %1 = vector.load %arg3[%c0_1, %c0_2] : memref<128x128xbf16, #tpu.memory_space<vmem>>, vector<128x128xbf16>
    %cst = arith.constant dense<0.000000e+00> : vector<128x128xf32>
    %2 = tpu.matmul %0, %1, %cst {dimension_numbers = #tpu.dot_dimension_numbers<[1], [0], [0], [1], [0, 0, 1, 1], [], []>} : vector<128x128xbf16>, vector<128x128xbf16>, vector<128x128xf32> -> vector<128x128xf32>
    %c0_3 = arith.constant 0 : index
    %c0_4 = arith.constant 0 : index
    %3 = vector.load %arg4[%c0_3, %c0_4] : memref<1x128xf32, #tpu.memory_space<vmem>>, vector<1x128xf32>
    %4 = vector.broadcast %3 : vector<1x128xf32> to vector<128x128xf32>
    %5 = arith.addf %2, %4 : vector<128x128xf32>
    %cst_5 = arith.constant 0.000000e+00 : f32
    %6 = vector.broadcast %cst_5 : f32 to vector<128x128xf32>
    %7 = arith.cmpf ogt, %5, %6 : vector<128x128xf32>
    %cst_6 = arith.constant 0.00999999977 : f32
    %8 = vector.broadcast %cst_6 : f32 to vector<128x128xf32>
    %9 = arith.mulf %8, %5 : vector<128x128xf32>
    %10 = arith.select %7, %5, %9 : vector<128x128xi1>, vector<128x128xf32>
    %11 = arith.truncf %10 : vector<128x128xf32> to vector<128x128xbf16>
    %c0_7 = arith.constant 0 : index
    %c0_8 = arith.constant 0 : index
    %12 = vector.load %arg5[%c0_7, %c0_8] : memref<128x128xbf16, #tpu.memory_space<vmem>>, vector<128x128xbf16>
    %cst_9 = arith.constant dense<0.000000e+00> : vector<128x128xf32>
    %13 = tpu.matmul %11, %12, %cst_9 {dimension_numbers = #tpu.dot_dimension_numbers<[1], [0], [0], [1], [0, 0, 1, 1], [], []>} : vector<128x128xbf16>, vector<128x128xbf16>, vector<128x128xf32> -> vector<128x128xf32>
    %c0_10 = arith.constant 0 : index
    %c0_11 = arith.constant 0 : index
    %14 = vector.load %arg6[%c0_10, %c0_11] : memref<1x128xf32, #tpu.memory_space<vmem>>, vector<1x128xf32>
    %15 = vector.broadcast %14 : vector<1x128xf32> to vector<128x128xf32>
    %16 = arith.addf %13, %15 : vector<128x128xf32>
    %cst_12 = arith.constant 0.000000e+00 : f32
    %17 = vector.broadcast %cst_12 : f32 to vector<128x128xf32>
    %18 = arith.cmpf ogt, %16, %17 : vector<128x128xf32>
    %c0_13 = arith.constant 0 : index
    %c0_14 = arith.constant 0 : index
    %19 = vector.load %arg7[%c0_13, %c0_14] : memref<1x128xf32, #tpu.memory_space<vmem>>, vector<1x128xf32>
    %20 = vector.broadcast %19 : vector<1x128xf32> to vector<128x128xf32>
    %21 = arith.mulf %20, %16 : vector<128x128xf32>
    %22 = arith.select %18, %16, %21 : vector<128x128xi1>, vector<128x128xf32>
    %23 = arith.truncf %22 : vector<128x128xf32> to vector<128x128xbf16>
    %c0_15 = arith.constant 0 : index
    %c0_16 = arith.constant 0 : index
    %24 = vector.load %arg8[%c0_15, %c0_16] : memref<128x384xbf16, #tpu.memory_space<vmem>>, vector<128x384xbf16>
    %cst_17 = arith.constant dense<0.000000e+00> : vector<128x384xf32>
    %25 = tpu.matmul %23, %24, %cst_17 {dimension_numbers = #tpu.dot_dimension_numbers<[1], [0], [0], [1], [0, 0, 1, 1], [], []>} : vector<128x128xbf16>, vector<128x384xbf16>, vector<128x384xf32> -> vector<128x384xf32>
    %26 = vector.extract_strided_slice %25 {offsets = [0, 0], sizes = [128, 128], strides = [1, 1]} : vector<128x384xf32> to vector<128x128xf32>
    %c0_18 = arith.constant 0 : index
    %c0_19 = arith.constant 0 : index
    %27 = vector.load %arg9[%c0_18, %c0_19] : memref<1x128xf32, #tpu.memory_space<vmem>>, vector<1x128xf32>
    %28 = vector.broadcast %27 : vector<1x128xf32> to vector<128x128xf32>
    %29 = arith.addf %26, %28 : vector<128x128xf32>
    %30 = vector.extract_strided_slice %25 {offsets = [0, 128], sizes = [128, 128], strides = [1, 1]} : vector<128x384xf32> to vector<128x128xf32>
    %31 = arith.truncf %30 : vector<128x128xf32> to vector<128x128xbf16>
    %c0_20 = arith.constant 0 : index
    %c0_21 = arith.constant 0 : index
    %c0_22 = arith.constant 0 : index
    %32 = vector.load %arg2[%c0_20, %c0_21, %c0_22] : memref<2x128x128xbf16, #tpu.memory_space<vmem>>, vector<1x128x128xbf16>
    %33 = vector.shape_cast %32 : vector<1x128x128xbf16> to vector<128x128xbf16>
    %cst_23 = arith.constant dense<0.000000e+00> : vector<128x128xf32>
    %34 = tpu.matmul %33, %31, %cst_23 {dimension_numbers = #tpu.dot_dimension_numbers<[1], [0], [0], [1], [0, 0, 1, 1], [], []>} : vector<128x128xbf16>, vector<128x128xbf16>, vector<128x128xf32> -> vector<128x128xf32>
    %35 = arith.addf %29, %34 : vector<128x128xf32>
    %36 = vector.extract_strided_slice %25 {offsets = [0, 256], sizes = [128, 128], strides = [1, 1]} : vector<128x384xf32> to vector<128x128xf32>
    %37 = arith.truncf %36 : vector<128x128xf32> to vector<128x128xbf16>
    %c1 = arith.constant 1 : index
    %c0_24 = arith.constant 0 : index
    %c0_25 = arith.constant 0 : index
    %38 = vector.load %arg2[%c1, %c0_24, %c0_25] : memref<2x128x128xbf16, #tpu.memory_space<vmem>>, vector<1x128x128xbf16>
    %39 = vector.shape_cast %38 : vector<1x128x128xbf16> to vector<128x128xbf16>
    %cst_26 = arith.constant dense<0.000000e+00> : vector<128x128xf32>
    %40 = tpu.matmul %39, %37, %cst_26 {dimension_numbers = #tpu.dot_dimension_numbers<[1], [0], [0], [1], [0, 0, 1, 1], [], []>} : vector<128x128xbf16>, vector<128x128xbf16>, vector<128x128xf32> -> vector<128x128xf32>
    %41 = arith.addf %35, %40 : vector<128x128xf32>
    %42 = arith.truncf %41 : vector<128x128xf32> to vector<128x128xbf16>
    %c0_27 = arith.constant 0 : index
    %c0_28 = arith.constant 0 : index
    %43 = vector.load %arg10[%c0_27, %c0_28] : memref<128x384xbf16, #tpu.memory_space<vmem>>, vector<128x384xbf16>
    %cst_29 = arith.constant dense<0.000000e+00> : vector<128x384xf32>
    %44 = tpu.matmul %42, %43, %cst_29 {dimension_numbers = #tpu.dot_dimension_numbers<[1], [0], [0], [1], [0, 0, 1, 1], [], []>} : vector<128x128xbf16>, vector<128x384xbf16>, vector<128x384xf32> -> vector<128x384xf32>
    %45 = vector.extract_strided_slice %44 {offsets = [0, 0], sizes = [128, 128], strides = [1, 1]} : vector<128x384xf32> to vector<128x128xf32>
    %c0_30 = arith.constant 0 : index
    %c0_31 = arith.constant 0 : index
    %46 = vector.load %arg11[%c0_30, %c0_31] : memref<1x128xf32, #tpu.memory_space<vmem>>, vector<1x128xf32>
    %47 = vector.broadcast %46 : vector<1x128xf32> to vector<128x128xf32>
    %48 = arith.addf %45, %47 : vector<128x128xf32>
    %49 = vector.extract_strided_slice %44 {offsets = [0, 128], sizes = [128, 128], strides = [1, 1]} : vector<128x384xf32> to vector<128x128xf32>
    %50 = arith.truncf %49 : vector<128x128xf32> to vector<128x128xbf16>
    %c0_32 = arith.constant 0 : index
    %c0_33 = arith.constant 0 : index
    %c0_34 = arith.constant 0 : index
    %51 = vector.load %arg2[%c0_32, %c0_33, %c0_34] : memref<2x128x128xbf16, #tpu.memory_space<vmem>>, vector<1x128x128xbf16>
    %52 = vector.shape_cast %51 : vector<1x128x128xbf16> to vector<128x128xbf16>
    %cst_35 = arith.constant dense<0.000000e+00> : vector<128x128xf32>
    %53 = tpu.matmul %52, %50, %cst_35 {dimension_numbers = #tpu.dot_dimension_numbers<[1], [0], [0], [1], [0, 0, 1, 1], [], []>} : vector<128x128xbf16>, vector<128x128xbf16>, vector<128x128xf32> -> vector<128x128xf32>
    %54 = arith.addf %48, %53 : vector<128x128xf32>
    %55 = vector.extract_strided_slice %44 {offsets = [0, 256], sizes = [128, 128], strides = [1, 1]} : vector<128x384xf32> to vector<128x128xf32>
    %56 = arith.truncf %55 : vector<128x128xf32> to vector<128x128xbf16>
    %c1_36 = arith.constant 1 : index
    %c0_37 = arith.constant 0 : index
    %c0_38 = arith.constant 0 : index
    %57 = vector.load %arg2[%c1_36, %c0_37, %c0_38] : memref<2x128x128xbf16, #tpu.memory_space<vmem>>, vector<1x128x128xbf16>
    %58 = vector.shape_cast %57 : vector<1x128x128xbf16> to vector<128x128xbf16>
    %cst_39 = arith.constant dense<0.000000e+00> : vector<128x128xf32>
    %59 = tpu.matmul %58, %56, %cst_39 {dimension_numbers = #tpu.dot_dimension_numbers<[1], [0], [0], [1], [0, 0, 1, 1], [], []>} : vector<128x128xbf16>, vector<128x128xbf16>, vector<128x128xf32> -> vector<128x128xf32>
    %60 = arith.addf %54, %59 : vector<128x128xf32>
    %61 = arith.truncf %60 : vector<128x128xf32> to vector<128x128xbf16>
    %c0_40 = arith.constant 0 : index
    %c0_41 = arith.constant 0 : index
    %62 = vector.load %arg12[%c0_40, %c0_41] : memref<128x128xbf16, #tpu.memory_space<vmem>>, vector<128x128xbf16>
    %cst_42 = arith.constant dense<0.000000e+00> : vector<128x128xf32>
    %63 = tpu.matmul %61, %62, %cst_42 {dimension_numbers = #tpu.dot_dimension_numbers<[1], [0], [0], [1], [0, 0, 1, 1], [], []>} : vector<128x128xbf16>, vector<128x128xbf16>, vector<128x128xf32> -> vector<128x128xf32>
    %c0_43 = arith.constant 0 : index
    %c0_44 = arith.constant 0 : index
    %64 = vector.load %arg13[%c0_43, %c0_44] : memref<1x128xf32, #tpu.memory_space<vmem>>, vector<1x128xf32>
    %65 = vector.broadcast %64 : vector<1x128xf32> to vector<128x128xf32>
    %66 = arith.addf %63, %65 : vector<128x128xf32>
    %c0_45 = arith.constant 0 : index
    %c0_46 = arith.constant 0 : index
    %67 = vector.load %arg14[%c0_45, %c0_46] : memref<128x128xf32, #tpu.memory_space<vmem>>, vector<128x128xf32>
    tpu.vector_store %arg14[%c0_45, %c0_46], %66 {strides = array<i32>} : memref<128x128xf32, #tpu.memory_space<vmem>>, vector<128x128xf32>,
    return
  }
  func.func @transform_0(%arg0: i32) -> (i32, i32) {
    %c0_i32 = arith.constant 0 : i32
    %c0_i32_0 = arith.constant 0 : i32
    %c0_i32_1 = arith.constant 0 : i32
    return %c0_i32, %c0_i32_0 : i32, i32
  }
  func.func @transform_1(%arg0: i32) -> (i32, i32, i32) {
    %c0_i32 = arith.constant 0 : i32
    %c0_i32_0 = arith.constant 0 : i32
    %c0_i32_1 = arith.constant 0 : i32
    %c0_i32_2 = arith.constant 0 : i32
    return %c0_i32, %c0_i32_0, %c0_i32_1 : i32, i32, i32
  }
  func.func @transform_2(%arg0: i32) -> (i32, i32) {
    %c0_i32 = arith.constant 0 : i32
    %c0_i32_0 = arith.constant 0 : i32
    %c0_i32_1 = arith.constant 0 : i32
    return %c0_i32, %c0_i32_0 : i32, i32
  }
  func.func @transform_3(%arg0: i32) -> (i32, i32) {
    %c0_i32 = arith.constant 0 : i32
    %c0_i32_0 = arith.constant 0 : i32
    %c0_i32_1 = arith.constant 0 : i32
    return %c0_i32, %c0_i32_0 : i32, i32
  }
  func.func @transform_4(%arg0: i32) -> (i32, i32) {
    %c0_i32 = arith.constant 0 : i32
    %c0_i32_0 = arith.constant 0 : i32
    %c0_i32_1 = arith.constant 0 : i32
    return %c0_i32, %c0_i32_0 : i32, i32
  }
  func.func @transform_5(%arg0: i32) -> (i32, i32) {
    %c0_i32 = arith.constant 0 : i32
    %c0_i32_0 = arith.constant 0 : i32
    %c0_i32_1 = arith.constant 0 : i32
    return %c0_i32, %c0_i32_0 : i32, i32
  }
  func.func @transform_6(%arg0: i32) -> (i32, i32) {
    %c0_i32 = arith.constant 0 : i32
    %c0_i32_0 = arith.constant 0 : i32
    %c0_i32_1 = arith.constant 0 : i32
    return %c0_i32, %c0_i32_0 : i32, i32
  }
  func.func @transform_7(%arg0: i32) -> (i32, i32) {
    %c0_i32 = arith.constant 0 : i32
    %c0_i32_0 = arith.constant 0 : i32
    %c0_i32_1 = arith.constant 0 : i32
    return %c0_i32, %c0_i32_0 : i32, i32
  }
  func.func @transform_8(%arg0: i32) -> (i32, i32) {
    %c0_i32 = arith.constant 0 : i32
    %c0_i32_0 = arith.constant 0 : i32
    %c0_i32_1 = arith.constant 0 : i32
    return %c0_i32, %c0_i32_0 : i32, i32
  }
  func.func @transform_9(%arg0: i32) -> (i32, i32) {
    %c0_i32 = arith.constant 0 : i32
    %c0_i32_0 = arith.constant 0 : i32
    %c0_i32_1 = arith.constant 0 : i32
    return %c0_i32, %c0_i32_0 : i32, i32
  }
  func.func @transform_10(%arg0: i32) -> (i32, i32) {
    %c0_i32 = arith.constant 0 : i32
    %c0_i32_0 = arith.constant 0 : i32
    %c0_i32_1 = arith.constant 0 : i32
    return %c0_i32, %c0_i32_0 : i32, i32
  }
  func.func @transform_11(%arg0: i32) -> (i32, i32) {
    %c0_i32 = arith.constant 0 : i32
    %c0_i32_0 = arith.constant 0 : i32
    %c0_i32_1 = arith.constant 0 : i32
    return %c0_i32, %c0_i32_0 : i32, i32
  }
  func.func @transform_12(%arg0: i32) -> (i32, i32) {
    %c0_i32 = arith.constant 0 : i32
    %c0_i32_0 = arith.constant 0 : i32
    %c0_i32_1 = arith.constant 0 : i32
    return %c0_i32, %c0_i32_0 : i32, i32
  }
  func.func @transform_13(%arg0: i32) -> (i32, i32) {
    %c0_i32 = arith.constant 0 : i32
    %c0_i32_0 = arith.constant 0 : i32
    %c0_i32_1 = arith.constant 0 : i32
    return %c0_i32, %c0_i32_0 : i32, i32
  }
}

</mosaic_0001>

<bundles_post_ra>
// kernel: forward.1
= control target key start
LH: loop header
LB: loop body
LE: loop exit
PB: predicated region body
PF: predicated region fallthrough
CT: control target
= control target key end

     0   :  { %s3581_s0 = inlined_call_operand.vmem [shape: bf16[128,128], index: 0, kind: input, shape index: {}]   ;;  %s3582_s1 = inlined_call_operand.vmem [shape: bf16[2,128,128], index: 1, kind: input, shape index: {}]   ;;  %s3583_s2 = inlined_call_operand.vmem [shape: bf16[128,128], index: 2, kind: input, shape index: {}]   ;;  %s3584_s3 = inlined_call_operand.vmem [shape: f32[1,128], index: 3, kind: input, shape index: {}]   ;;  %s3585_s4 = inlined_call_operand.vmem [shape: bf16[128,128], index: 4, kind: input, shape index: {}]   ;;  %s3586_s5 = inlined_call_operand.vmem [shape: f32[1,128], index: 5, kind: input, shape index: {}]   ;;  %s3587_s6 = inlined_call_operand.vmem [shape: f32[1,128], index: 6, kind: input, shape index: {}]   ;;  %s3588_s7 = inlined_call_operand.vmem [shape: bf16[128,384], index: 7, kind: input, shape index: {}]   ;;  %s3589_s8 = inlined_call_operand.vmem [shape: f32[1,128], index: 8, kind: input, shape index: {}]   ;;  %s3590_s9 = inlined_call_operand.vmem [shape: bf16[128,384], index: 9, kind: input, shape index: {}]   ;;  %s3591_s10 = inlined_call_operand.vmem [shape: f32[1,128], index: 10, kind: input, shape index: {}]   ;;  %s3592_s11 = inlined_call_operand.vmem [shape: bf16[128,128], index: 11, kind: input, shape index: {}]   ;;  %s3593_s12 = inlined_call_operand.vmem [shape: f32[1,128], index: 12, kind: input, shape index: {}]   ;;  %s3594_s13 = inlined_call_operand.hbm [shape: f32[128,128], index: 13, kind: output, shape index: {}]  }
   0x1   :  { %v2750_v0 = vld [vmem:[%s3583_s2] sm:$0xff]   ;;  %v2751_v1 = vld [vmem:[%s3583_s2 + $0x8] sm:$0xff]   ;;  %v2752_v2 = vld [vmem:[%s3583_s2 + $0x10] sm:$0xff]  }
   0x2   :  { %2442 = vmatprep.subr.bf16.mxu0 %v2750_v0  ;;  %v2753_v3 = vld [vmem:[%s3583_s2 + $0x18] sm:$0xff]   ;;  %v2758_v4 = vld [vmem:[%s3581_s0] sm:$0xff]   ;;  %v2755_v6 = vld [vmem:[%s3583_s2 + $0x28] sm:$0xff]  }
   0x3   :  { %2443 = vmatpush3.bf16.msra.mxu0 %v2750_v0  ;;  %2458 = vmatprep.mubr.bf16.mxu0 %v2758_v4  ;;  %v2754_v5 = vld [vmem:[%s3583_s2 + $0x20] sm:$0xff]   ;;  %v2767_v8 = vld [vmem:[%s3585_s4 + $0x8] sm:$0xff]   ;;  %v2756_v9 = vld [vmem:[%s3583_s2 + $0x30] sm:$0xff]  }
   0x4   :  { %2444 = vmatprep.subr.bf16.mxu0 %v2751_v1  ;;  %v2766_v7 = vld [vmem:[%s3585_s4] sm:$0xff]   ;;  %v2768_v10 = vld [vmem:[%s3585_s4 + $0x10] sm:$0xff]   ;;  %v2757_v11 = vld [vmem:[%s3583_s2 + $0x38] sm:$0xff]  }
   0x5   :  { %2474 = vmatprep.subr.bf16.mxu1 %v2766_v7  ;;  %v2769_v12 = vld [vmem:[%s3585_s4 + $0x18] sm:$0xff]   ;;  %v2770_v13 = vld [vmem:[%s3585_s4 + $0x20] sm:$0xff]   ;;  %v2759_v14 = vld [vmem:[%s3581_s0 + $0x8] sm:$0xff]  }
   0x6   :  { %2475 = vmatpush3.bf16.msra.mxu1 %v2766_v7  ;;  %v2760_v15 = vld [vmem:[%s3581_s0 + $0x10] sm:$0xff]   ;;  %v2761_v16 = vld [vmem:[%s3581_s0 + $0x18] sm:$0xff]   ;;  %v2762_v17 = vld [vmem:[%s3581_s0 + $0x20] sm:$0xff]  }
   0x7   :  { %2445 = vmatpush3.bf16.msra.mxu0 %v2751_v1  ;;  %2476 = vmatprep.subr.bf16.mxu1 %v2767_v8  ;;  %v2763_v18 = vld [vmem:[%s3581_s0 + $0x28] sm:$0xff]   ;;  %v2764_v19 = vld [vmem:[%s3581_s0 + $0x30] sm:$0xff]   ;;  %v2765_v20 = vld [vmem:[%s3581_s0 + $0x38] sm:$0xff]  }
   0x8   :  { %2446 = vmatprep.subr.bf16.mxu0 %v2752_v2 }
   0xa   :  { %2477 = vmatpush3.bf16.msra.mxu1 %v2767_v8 }
   0xb   :  { %2447 = vmatpush3.bf16.msra.mxu0 %v2752_v2  ;;  %2478 = vmatprep.subr.bf16.mxu1 %v2768_v10 }
   0xc   :  { %2448 = vmatprep.subr.bf16.mxu0 %v2753_v3 }
   0xe   :  { %2479 = vmatpush3.bf16.msra.mxu1 %v2768_v10 }
   0xf   :  { %2449 = vmatpush3.bf16.msra.mxu0 %v2753_v3  ;;  %2480 = vmatprep.subr.bf16.mxu1 %v2769_v12 }
  0x10   :  { %2450 = vmatprep.subr.bf16.mxu0 %v2754_v5 }
  0x12   :  { %2481 = vmatpush3.bf16.msra.mxu1 %v2769_v12 }
  0x13   :  { %2451 = vmatpush3.bf16.msra.mxu0 %v2754_v5  ;;  %2482 = vmatprep.subr.bf16.mxu1 %v2770_v13 }
  0x14   :  { %2452 = vmatprep.subr.bf16.mxu0 %v2755_v6 }
  0x16   :  { %2483 = vmatpush3.bf16.msra.mxu1 %v2770_v13 }
  0x17   :  { %2453 = vmatpush3.bf16.msra.mxu0 %v2755_v6 }
  0x18   :  { %2454 = vmatprep.subr.bf16.mxu0 %v2756_v9 }
  0x1b   :  { %2455 = vmatpush3.bf16.msra.mxu0 %v2756_v9 }
  0x1c   :  { %2456 = vmatprep.subr.bf16.mxu0 %v2757_v11 }
  0x1f   :  { %2457 = vmatpush3.bf16.msra.mxu0 %v2757_v11 }
  0x22   :  { %2459 = vmatmul.mubr.bf16.vlgmr.msra.gmra.mrb[0].mxu0 %v2759_v14 }
  0x23   :  { %2462 = vmatprep.mubr.bf16.mxu0 %v2760_v15 }
  0x2a   :  { %2463 = vmatmul.mubr.bf16.gmra.mrb[4].mxu0 %v2761_v16 }
  0x2b   :  { %2466 = vmatprep.mubr.bf16.mxu0 %v2762_v17 }
  0x32   :  { %2467 = vmatmul.mubr.bf16.gmra.mrb[8].mxu0 %v2763_v18 }
  0x33   :  { %2470 = vmatprep.mubr.bf16.mxu0 %v2764_v19 }
  0x3a   :  { %2471 = vmatmul.mubr.bf16.gmra.mrb[12].mxu0 %v2765_v20 }
  0x3b   :  { %18 = vsyncpa [#allocation3], 0  ;;  %v2771_v21 = vld [vmem:[%s3585_s4 + $0x28] sm:$0xff]   ;;  %v2772_v22 = vld [vmem:[%s3585_s4 + $0x30] sm:$0xff]  }
  0x3c   :  { %2484 = vmatprep.subr.bf16.mxu1 %v2771_v21  ;;  %v2773_v23 = vld [vmem:[%s3585_s4 + $0x38] sm:$0xff]   ;;  %v2774_v24 = vld [vmem:[%s3588_s7] ss:$12 sps:$4 sm:$0xff]   ;;  %v2776_v25 = vld [vmem:[%s3588_s7 + $0x4] ss:$12 sps:$4 sm:$0xff]  }
  0x3d   :  { %2485 = vmatpush3.bf16.msra.mxu1 %v2771_v21  ;;  %v3041_v26 = vld [vmem:[%s3588_s7 + $0x8] ss:$12 sps:$4 sm:$0xff]   ;;  %725 = vmatprep.subr.bf16.mxu0 %v2776_v25  ;;  %v2778_v28 = vld [vmem:[%s3588_s7 + $0x18] ss:$12 sps:$4 sm:$0xff]   ;;  %v2782_v30 = vld [vmem:[%s3588_s7 + $0x30] ss:$12 sps:$4 sm:$0xff]  }
  0x3e   :  { %2486 = vmatprep.subr.bf16.mxu1 %v2772_v22  ;;  %v2780_v27 = vld [vmem:[%s3588_s7 + $0x1c] ss:$12 sps:$4 sm:$0xff]   ;;  %726 = vmatpush1.bf16.msra.mxu0 %v2774_v24  ;;  %v2784_v29 = vld [vmem:[%s3588_s7 + $0x34] ss:$12 sps:$4 sm:$0xff]   ;;  %v2788_v31 = vld [vmem:[%s3588_s7 + $0x4c] ss:$12 sps:$4 sm:$0xff]  }
  0x3f   :  { %727 = vmatprep.subr.bf16.mxu0 %v2780_v27  ;;  %v2786_v32 = vld [vmem:[%s3588_s7 + $0x48] ss:$12 sps:$4 sm:$0xff]   ;;  %v2792_v33 = vld [vmem:[%s3588_s7 + $0x64] ss:$12 sps:$4 sm:$0xff]   ;;  %v2790_v34 = vld [vmem:[%s3588_s7 + $0x60] ss:$12 sps:$4 sm:$0xff]  }
  0x40   :  { %v2796_v35 = vld [vmem:[%s3588_s7 + $0x7c] ss:$12 sps:$4 sm:$0xff]   ;;  %v2794_v36 = vld [vmem:[%s3588_s7 + $0x78] ss:$12 sps:$4 sm:$0xff]   ;;  %v3077_v37 = vld [vmem:[%s3584_s3] ss:$0 sm:$0xff] }
  0x41   :  { %2487 = vmatpush3.bf16.msra.mxu1 %v2772_v22  ;;  %v2781_v61 = vld [vmem:[%s3588_s7 + $0x20] ss:$12 sps:$4 sm:$0xff]   ;;  %v2785_v7 = vld [vmem:[%s3588_s7 + $0x38] ss:$12 sps:$4 sm:$0xff]   ;;  %v2789_v17 = vld [vmem:[%s3588_s7 + $0x50] ss:$12 sps:$4 sm:$0xff]  }
  0x42   :  { %2488 = vmatprep.subr.bf16.mxu1 %v2773_v23  ;;  %728 = vmatpush1.bf16.msra.mxu0 %v2778_v28  ;;  %v2793_v27 = vld [vmem:[%s3588_s7 + $0x68] ss:$12 sps:$4 sm:$0xff]  }
  0x43   :  { %729 = vmatprep.subr.bf16.mxu0 %v2784_v29 }
  0x45   :  { %2489 = vmatpush3.bf16.msra.mxu1 %v2773_v23 }
  0x46   :  { %2506 = vmatprep.subr.bf16.mxu1 %v3041_v26  ;;  %730 = vmatpush1.bf16.msra.mxu0 %v2782_v30 }
  0x47   :  { %731 = vmatprep.subr.bf16.mxu0 %v2788_v31 }
  0x4a   :  { %732 = vmatpush1.bf16.msra.mxu0 %v2786_v32 }
  0x4b   :  { %733 = vmatprep.subr.bf16.mxu0 %v2792_v33 }
  0x4e   :  { %734 = vmatpush1.bf16.msra.mxu0 %v2790_v34 }
  0x4f   :  { %735 = vmatprep.subr.bf16.mxu0 %v2796_v35 }
  0x52   :  { %736 = vmatpush1.bf16.msra.mxu0 %v2794_v36 }
  0xf5   :  { %v2460_v38 = vpop.f32.mrb[0].mxu0 }
  0xf6   :  { %v224_v39 = vadd.f32 %v2460_v38, %v3077_v37  ;;  %v215_v40 = vpop.f32.mrb[1].mxu0 }
  0xf7   :  { %v216_v41 = vadd.f32 %v3077_v37, %v215_v40  ;;  %v2461_v42 = vpop.f32.mrb[2].mxu0 }
  0xf8   :  { %v296_v43 = vmul.f32 0.01, %v224_v39  ;;  %v227_v44 = vadd.f32 %v2461_v42, %v3077_v37  ;;  %v218_v45 = vpop.f32.mrb[3].mxu0  ;;  %vm280_vm0 = vcmp.gt.f32.partialorder %v224_v39, 0.0 }
  0xf9   :  { %v294_v46 = vmul.f32 0.01, %v216_v41  ;;  %v219_v47 = vadd.f32 %v3077_v37, %v218_v45  ;;  %vm278_vm2 = vcmp.gt.f32.partialorder %v216_v41, 0.0 }
  0xfa   :  { %vm281_vm1 = vcmp.gt.f32.partialorder %v227_v44, 0.0  ;;  %v297_v48 = vmul.f32 0.01, %v227_v44  ;;  %v312_v50 = vsel %vm280_vm0, %v224_v39, %v296_v43 }
  0xfb   :  { %v295_v49 = vmul.f32 0.01, %v219_v47  ;;  %vm279_vm3 = vcmp.gt.f32.partialorder %v219_v47, 0.0  ;;  %v310_v53 = vsel %vm278_vm2, %v216_v41, %v294_v46 }
  0xfc   :  { %v313_v51 = vsel %vm281_vm1, %v227_v44, %v297_v48 }
  0xfd   :  { %v2464_v52 = vpop.f32.mrb[4].mxu0  ;;  %v311_v54 = vsel %vm279_vm3, %v219_v47, %v295_v49  ;;  %v327_v55 = vpack.c.bf16 %v313_v51, %v312_v50  ;;  %v2797_v51 = vld [vmem:[%s3588_s7 + $0x80] ss:$12 sps:$4 sm:$0xff]  }
  0xfe   :  { %v240_v56 = vadd.f32 %v2464_v52, %v3077_v37  ;;  %v231_v57 = vpop.f32.mrb[5].mxu0  ;;  %v326_v58 = vpack.c.bf16 %v311_v54, %v310_v53  ;;  %v2798_v52 = vld [vmem:[%s3588_s7 + $0x90] ss:$12 sps:$4 sm:$0xff]   ;;  %v2801_v53 = vld [vmem:[%s3588_s7 + $0x98] ss:$12 sps:$4 sm:$0xff]  }
  0xff   :  { %v232_v59 = vadd.f32 %v3077_v37, %v231_v57  ;;  %v2465_v60 = vpop.f32.mrb[6].mxu0  ;;  %v2804_v54 = vld [vmem:[%s3588_s7 + $0xac] ss:$12 sps:$4 sm:$0xff]   ;;  %v3595_v57 = vmov 0  }
 0x100   :  { %vm284_vm4 = vcmp.gt.f32.partialorder %v240_v56, 0.0  ;;  %v300_v62 = vmul.f32 0.01, %v240_v56  ;;  %v243_v63 = vadd.f32 %v2465_v60, %v3077_v37  ;;  %v234_v0 = vpop.f32.mrb[7].mxu0  ;;  %2490 = vmatprep.mubr.bf16.mxu1 %v326_v58  ;;  %757 = vmatprep.mubr.bf16.mxu0 %v3595_v57  ;;  %v3133_v58 = vld [vmem:[%s3586_s5] ss:$0 sm:$0xff] }
 0x101   :  { %vm282_vm5 = vcmp.gt.f32.partialorder %v232_v59, 0.0  ;;  %v298_v1 = vmul.f32 0.01, %v232_v59  ;;  %v235_v2 = vadd.f32 %v3077_v37, %v234_v0  ;;  %2491 = vmatmul.mubr.bf16.vlgmr.msra.gmra.mrb[0].mxu1 %v327_v55  ;;  %v2802_v55 = vld [vmem:[%s3588_s7 + $0xa8] ss:$12 sps:$4 sm:$0xff]  }
 0x102   :  { %vm285_vm6 = vcmp.gt.f32.partialorder %v243_v63, 0.0  ;;  %v301_v3 = vmul.f32 0.01, %v243_v63  ;;  %v316_v4 = vsel %vm284_vm4, %v240_v56, %v300_v62  ;;  %2507 = vmatpush3.bf16.msra.mxu1 %v3041_v26  ;;  %v2805_v56 = vld [vmem:[%s3588_s7 + $0xb0] ss:$12 sps:$4 sm:$0xff]  }
 0x103   :  { %vm283_vm7 = vcmp.gt.f32.partialorder %v235_v2, 0.0  ;;  %v299_v5 = vmul.f32 0.01, %v235_v2  ;;  %v314_v6 = vsel %vm282_vm5, %v232_v59, %v298_v1  ;;  %2508 = vmatprep.subr.bf16.mxu1 %v2781_v61  ;;  %v3138_v60 = vld [vmem:[%s3587_s6] ss:$0 sm:$0xff] }
 0x104   :  { %v317_v8 = vsel %vm285_vm6, %v243_v63, %v301_v3 }
 0x105   :  { %v2468_v9 = vpop.f32.mrb[8].mxu0  ;;  %v315_v10 = vsel %vm283_vm7, %v235_v2, %v299_v5  ;;  %v329_v11 = vpack.c.bf16 %v317_v8, %v316_v4 }
 0x106   :  { %v256_v12 = vadd.f32 %v2468_v9, %v3077_v37  ;;  %v247_v13 = vpop.f32.mrb[9].mxu0  ;;  %v328_v14 = vpack.c.bf16 %v315_v10, %v314_v6  ;;  %2509 = vmatpush3.bf16.msra.mxu1 %v2781_v61 }
 0x107   :  { %v248_v15 = vadd.f32 %v3077_v37, %v247_v13  ;;  %v2469_v16 = vpop.f32.mrb[10].mxu0  ;;  %2510 = vmatprep.subr.bf16.mxu1 %v2785_v7 }
 0x108   :  { %vm288_vm8 = vcmp.gt.f32.partialorder %v256_v12, 0.0  ;;  %v304_v18 = vmul.f32 0.01, %v256_v12  ;;  %v259_v19 = vadd.f32 %v2469_v16, %v3077_v37  ;;  %v250_v20 = vpop.f32.mrb[11].mxu0  ;;  %2494 = vmatprep.mubr.bf16.mxu1 %v328_v14 }
 0x109   :  { %vm286_vm9 = vcmp.gt.f32.partialorder %v248_v15, 0.0  ;;  %v302_v21 = vmul.f32 0.01, %v248_v15  ;;  %v251_v22 = vadd.f32 %v3077_v37, %v250_v20  ;;  %2495 = vmatmul.mubr.bf16.gmra.mrb[4].mxu1 %v329_v11 }
 0x10a   :  { %vm289_vm10 = vcmp.gt.f32.partialorder %v259_v19, 0.0  ;;  %v305_v23 = vmul.f32 0.01, %v259_v19  ;;  %v320_v24 = vsel %vm288_vm8, %v256_v12, %v304_v18  ;;  %2511 = vmatpush3.bf16.msra.mxu1 %v2785_v7 }
 0x10b   :  { %vm287_vm11 = vcmp.gt.f32.partialorder %v251_v22, 0.0  ;;  %v303_v25 = vmul.f32 0.01, %v251_v22  ;;  %v318_v26 = vsel %vm286_vm9, %v248_v15, %v302_v21  ;;  %2512 = vmatprep.subr.bf16.mxu1 %v2789_v17 }
 0x10c   :  { %v321_v28 = vsel %vm289_vm10, %v259_v19, %v305_v23 }
 0x10d   :  { %v319_v29 = vsel %vm287_vm11, %v251_v22, %v303_v25  ;;  %v2472_v30 = vpop.f32.mrb[12].mxu0  ;;  %v331_v31 = vpack.c.bf16 %v321_v28, %v320_v24 }
 0x10e   :  { %v330_v32 = vpack.c.bf16 %v319_v29, %v318_v26  ;;  %v272_v33 = vadd.f32 %v2472_v30, %v3077_v37  ;;  %v263_v34 = vpop.f32.mrb[13].mxu0  ;;  %2513 = vmatpush3.bf16.msra.mxu1 %v2789_v17 }
 0x10f   :  { %v264_v35 = vadd.f32 %v3077_v37, %v263_v34  ;;  %v2473_v36 = vpop.f32.mrb[14].mxu0  ;;  %2514 = vmatprep.subr.bf16.mxu1 %v2793_v27 }
 0x110   :  { %2498 = vmatprep.mubr.bf16.mxu1 %v330_v32  ;;  %vm292_vm12 = vcmp.gt.f32.partialorder %v272_v33, 0.0  ;;  %v308_v38 = vmul.f32 0.01, %v272_v33  ;;  %v275_v39 = vadd.f32 %v2473_v36, %v3077_v37  ;;  %v266_v40 = vpop.f32.mrb[15].mxu0 }
 0x111   :  { %2499 = vmatmul.mubr.bf16.gmra.mrb[8].mxu1 %v331_v31  ;;  %vm290_vm13 = vcmp.gt.f32.partialorder %v264_v35, 0.0  ;;  %v306_v41 = vmul.f32 0.01, %v264_v35  ;;  %v267_v42 = vadd.f32 %v3077_v37, %v266_v40  ;;  %v2800_v37 = vld [vmem:[%s3588_s7 + $0x94] ss:$12 sps:$4 sm:$0xff]  }
 0x112   :  { %vm293_vm14 = vcmp.gt.f32.partialorder %v275_v39, 0.0  ;;  %v309_v43 = vmul.f32 0.01, %v275_v39  ;;  %v324_v44 = vsel %vm292_vm12, %v272_v33, %v308_v38  ;;  %2515 = vmatpush3.bf16.msra.mxu1 %v2793_v27  ;;  %737 = vmatprep.subr.bf16.mxu0 %v2800_v37 }
 0x113   :  { %vm291_vm15 = vcmp.gt.f32.partialorder %v267_v42, 0.0  ;;  %v307_v45 = vmul.f32 0.01, %v267_v42  ;;  %v322_v46 = vsel %vm290_vm13, %v264_v35, %v306_v41  ;;  %2516 = vmatprep.subr.bf16.mxu1 %v2797_v51  ;;  %738 = vmatpush1.bf16.msra.mxu0 %v2798_v52 }
 0x114   :  { %v325_v47 = vsel %vm293_vm14, %v275_v39, %v309_v43  ;;  %739 = vmatprep.subr.bf16.mxu0 %v2804_v54 }
 0x115   :  { %v323_v48 = vsel %vm291_vm15, %v267_v42, %v307_v45  ;;  %v333_v49 = vpack.c.bf16 %v325_v47, %v324_v44 }
 0x116   :  { %v332_v50 = vpack.c.bf16 %v323_v48, %v322_v46  ;;  %2517 = vmatpush3.bf16.msra.mxu1 %v2797_v51 }
 0x117   :  { %2518 = vmatprep.subr.bf16.mxu1 %v2801_v53  ;;  %740 = vmatpush1.bf16.msra.mxu0 %v2802_v55 }
 0x118   :  { %2502 = vmatprep.mubr.bf16.mxu1 %v332_v50 }
 0x119   :  { %2503 = vmatmul.mubr.bf16.gmra.mrb[12].mxu1 %v333_v49 }
 0x11a   :  { %2519 = vmatpush3.bf16.msra.mxu1 %v2801_v53 }
 0x11b   :  { %2520 = vmatprep.subr.bf16.mxu1 %v2805_v56 }
 0x11e   :  { %2521 = vmatpush3.bf16.msra.mxu1 %v2805_v56 }
 0x1d4   :  { %v2492_v59 = vpop.f32.mrb[0].mxu1 }
 0x1d5   :  { %v448_v61 = vadd.f32 %v2492_v59, %v3133_v58  ;;  %v439_v62 = vpop.f32.mrb[1].mxu1 }
 0x1d6   :  { %v440_v63 = vadd.f32 %v3133_v58, %v439_v62  ;;  %v2493_v0 = vpop.f32.mrb[2].mxu1 }
 0x1d7   :  { %v527_v1 = vmul.f32 %v3138_v60, %v448_v61  ;;  %v451_v2 = vadd.f32 %v2493_v0, %v3133_v58  ;;  %v442_v3 = vpop.f32.mrb[3].mxu1  ;;  %vm504_vm0 = vcmp.gt.f32.partialorder %v448_v61, 0.0 }
 0x1d8   :  { %v525_v4 = vmul.f32 %v3138_v60, %v440_v63  ;;  %v443_v5 = vadd.f32 %v3133_v58, %v442_v3  ;;  %vm502_vm1 = vcmp.gt.f32.partialorder %v440_v63, 0.0 }
 0x1d9   :  { %vm505_vm2 = vcmp.gt.f32.partialorder %v451_v2, 0.0  ;;  %v528_v6 = vmul.f32 %v3138_v60, %v451_v2  ;;  %v543_v8 = vsel %vm504_vm0, %v448_v61, %v527_v1 }
 0x1da   :  { %vm503_vm3 = vcmp.gt.f32.partialorder %v443_v5, 0.0  ;;  %v526_v7 = vmul.f32 %v3138_v60, %v443_v5  ;;  %v541_v10 = vsel %vm502_vm1, %v440_v63, %v525_v4 }
 0x1db   :  { %v544_v9 = vsel %vm505_vm2, %v451_v2, %v528_v6 }
 0x1dc   :  { %v558_v11 = vpack.c.bf16 %v544_v9, %v543_v8  ;;  %v542_v12 = vsel %vm503_vm3, %v443_v5, %v526_v7  ;;  %v2496_v13 = vpop.f32.mrb[4].mxu1 }
 0x1dd   :  { %v557_v14 = vpack.c.bf16 %v542_v12, %v541_v10  ;;  %v464_v15 = vadd.f32 %v2496_v13, %v3133_v58  ;;  %v455_v16 = vpop.f32.mrb[5].mxu1 }
 0x1de   :  { %v456_v17 = vadd.f32 %v3133_v58, %v455_v16  ;;  %v2497_v18 = vpop.f32.mrb[6].mxu1 }
 0x1df   :  { %v531_v19 = vmul.f32 %v3138_v60, %v464_v15  ;;  %v467_v20 = vadd.f32 %v2497_v18, %v3133_v58  ;;  %v458_v21 = vpop.f32.mrb[7].mxu1  ;;  %758 = vmatmul.mubr.bf16.vlgmr.msra.gmra.mrb[16].mxu0 %v557_v14  ;;  %2522 = vmatprep.mubr.bf16.mxu1 %v557_v14  ;;  %vm508_vm4 = vcmp.gt.f32.partialorder %v464_v15, 0.0 }
 0x1e0   :  { %v529_v22 = vmul.f32 %v3138_v60, %v456_v17  ;;  %v459_v23 = vadd.f32 %v3133_v58, %v458_v21  ;;  %2523 = vmatmul.mubr.bf16.vlgmr.msra.gmra.mrb[16].mxu1 %v558_v11  ;;  %767 = vmatprep.mubr.bf16.mxu0 %v3595_v57  ;;  %vm506_vm5 = vcmp.gt.f32.partialorder %v456_v17, 0.0 }
 0x1e1   :  { %vm509_vm6 = vcmp.gt.f32.partialorder %v467_v20, 0.0  ;;  %v532_v24 = vmul.f32 %v3138_v60, %v467_v20  ;;  %v547_v26 = vsel %vm508_vm4, %v464_v15, %v531_v19 }
 0x1e2   :  { %vm507_vm7 = vcmp.gt.f32.partialorder %v459_v23, 0.0  ;;  %v530_v25 = vmul.f32 %v3138_v60, %v459_v23  ;;  %v545_v29 = vsel %vm506_vm5, %v456_v17, %v529_v22 }
 0x1e3   :  { %v548_v27 = vsel %vm509_vm6, %v467_v20, %v532_v24 }
 0x1e4   :  { %v2500_v28 = vpop.f32.mrb[8].mxu1  ;;  %v546_v30 = vsel %vm507_vm7, %v459_v23, %v530_v25  ;;  %v560_v31 = vpack.c.bf16 %v548_v27, %v547_v26 }
 0x1e5   :  { %v480_v32 = vadd.f32 %v2500_v28, %v3133_v58  ;;  %v471_v33 = vpop.f32.mrb[9].mxu1  ;;  %v559_v34 = vpack.c.bf16 %v546_v30, %v545_v29 }
 0x1e6   :  { %v472_v35 = vadd.f32 %v3133_v58, %v471_v33  ;;  %v2501_v36 = vpop.f32.mrb[10].mxu1 }
 0x1e7   :  { %vm512_vm8 = vcmp.gt.f32.partialorder %v480_v32, 0.0  ;;  %v535_v38 = vmul.f32 %v3138_v60, %v480_v32  ;;  %v483_v39 = vadd.f32 %v2501_v36, %v3133_v58  ;;  %v474_v40 = vpop.f32.mrb[11].mxu1  ;;  %768 = vmatmul.mubr.bf16.gmra.mrb[20].mxu0 %v558_v11  ;;  %2526 = vmatprep.mubr.bf16.mxu1 %v559_v34 }
 0x1e8   :  { %vm510_vm9 = vcmp.gt.f32.partialorder %v472_v35, 0.0  ;;  %v533_v41 = vmul.f32 %v3138_v60, %v472_v35  ;;  %v475_v42 = vadd.f32 %v3133_v58, %v474_v40  ;;  %2527 = vmatmul.mubr.bf16.gmra.mrb[20].mxu1 %v560_v31  ;;  %777 = vmatprep.mubr.bf16.mxu0 %v3595_v57 }
 0x1e9   :  { %vm513_vm10 = vcmp.gt.f32.partialorder %v483_v39, 0.0  ;;  %v536_v43 = vmul.f32 %v3138_v60, %v483_v39  ;;  %v551_v44 = vsel %vm512_vm8, %v480_v32, %v535_v38 }
 0x1ea   :  { %vm511_vm11 = vcmp.gt.f32.partialorder %v475_v42, 0.0  ;;  %v534_v45 = vmul.f32 %v3138_v60, %v475_v42  ;;  %v549_v46 = vsel %vm510_vm9, %v472_v35, %v533_v41 }
 0x1eb   :  { %v552_v47 = vsel %vm513_vm10, %v483_v39, %v536_v43 }
 0x1ec   :  { %v550_v48 = vsel %vm511_vm11, %v475_v42, %v534_v45  ;;  %v2504_v49 = vpop.f32.mrb[12].mxu1  ;;  %v562_v50 = vpack.c.bf16 %v552_v47, %v551_v44 }
 0x1ed   :  { %v561_v51 = vpack.c.bf16 %v550_v48, %v549_v46  ;;  %v496_v37 = vadd.f32 %v2504_v49, %v3133_v58  ;;  %v487_v52 = vpop.f32.mrb[13].mxu1 }
 0x1ee   :  { %v488_v53 = vadd.f32 %v3133_v58, %v487_v52  ;;  %v2505_v54 = vpop.f32.mrb[14].mxu1 }
 0x1ef   :  { %778 = vmatmul.mubr.bf16.gmra.mrb[24].mxu0 %v559_v34  ;;  %2530 = vmatprep.mubr.bf16.mxu1 %v561_v51  ;;  %vm516_vm12 = vcmp.gt.f32.partialorder %v496_v37, 0.0  ;;  %v539_v55 = vmul.f32 %v3138_v60, %v496_v37  ;;  %v499_v56 = vadd.f32 %v2505_v54, %v3133_v58  ;;  %v490_v59 = vpop.f32.mrb[15].mxu1 }
 0x1f0   :  { %2531 = vmatmul.mubr.bf16.gmra.mrb[24].mxu1 %v562_v50  ;;  %vm514_vm13 = vcmp.gt.f32.partialorder %v488_v53, 0.0  ;;  %v537_v61 = vmul.f32 %v3138_v60, %v488_v53  ;;  %v491_v62 = vadd.f32 %v3133_v58, %v490_v59  ;;  %787 = vmatprep.mubr.bf16.mxu0 %v3595_v57  ;;  %v3182_v58 = vld [vmem:[%s3582_s1 + $0x40] sm:$0xff]  }
 0x1f1   :  { %vm517_vm14 = vcmp.gt.f32.partialorder %v499_v56, 0.0  ;;  %v540_v63 = vmul.f32 %v3138_v60, %v499_v56  ;;  %v555_v0 = vsel %vm516_vm12, %v496_v37, %v539_v55 }
 0x1f2   :  { %vm515_vm15 = vcmp.gt.f32.partialorder %v491_v62, 0.0  ;;  %v538_v1 = vmul.f32 %v3138_v60, %v491_v62  ;;  %v553_v2 = vsel %vm514_vm13, %v488_v53, %v537_v61  ;;  %v3187_v60 = vld [vmem:[%s3582_s1] sm:$0xff]   ;;  %v2825_v53 = vld [vmem:[%s3590_s9 + $0x8] ss:$12 sps:$4 sm:$0xff]  }
 0x1f3   :  { %v556_v3 = vsel %vm517_vm14, %v499_v56, %v540_v63  ;;  %v3217_v56 = vld [vmem:[%s3582_s1 + $0x48] sm:$0xff]   ;;  %v3222_v61 = vld [vmem:[%s3582_s1 + $0x50] sm:$0xff]  }
 0x1f4   :  { %v554_v4 = vsel %vm515_vm15, %v491_v62, %v538_v1  ;;  %v564_v5 = vpack.c.bf16 %v556_v3, %v555_v0  ;;  %v2829_v62 = vld [vmem:[%s3590_s9 + $0x20] ss:$12 sps:$4 sm:$0xff]   ;;  %v2833_v1 = vld [vmem:[%s3590_s9 + $0x38] ss:$12 sps:$4 sm:$0xff]  }
 0x1f5   :  { %v563_v6 = vpack.c.bf16 %v554_v4, %v553_v2  ;;  %v3239_v4 = vld [vmem:[%s3582_s1 + $0x58] sm:$0xff]  }
 0x1f7   :  { %788 = vmatmul.mubr.bf16.gmra.mrb[28].mxu0 %v560_v31  ;;  %2534 = vmatprep.mubr.bf16.mxu1 %v563_v6 }
 0x1f8   :  { %2535 = vmatmul.mubr.bf16.gmra.mrb[28].mxu1 %v564_v5  ;;  %797 = vmatprep.mubr.bf16.mxu0 %v3595_v57 }
 0x1f9   :  { %2554 = vmatprep.mubr.bf16.mxu1 %v3187_v60 }
 0x1ff   :  { %798 = vmatmul.mubr.bf16.gmra.mrb[32].mxu0 %v561_v51 }
 0x200   :  { %807 = vmatprep.mubr.bf16.mxu0 %v3595_v57 }
 0x207   :  { %808 = vmatmul.mubr.bf16.gmra.mrb[36].mxu0 %v562_v50 }
 0x208   :  { %817 = vmatprep.mubr.bf16.mxu0 %v3595_v57 }
 0x20f   :  { %818 = vmatmul.mubr.bf16.gmra.mrb[40].mxu0 %v563_v6  ;;  %v3244_v6 = vld [vmem:[%s3582_s1 + $0x60] sm:$0xff]  }
 0x210   :  { %827 = vmatprep.mubr.bf16.mxu0 %v3595_v57 }
 0x217   :  { %828 = vmatmul.mubr.bf16.gmra.mrb[44].mxu0 %v564_v5 }
 0x218   :  { %2586 = vmatprep.mubr.bf16.mxu0 %v3182_v58 }
 0x2b2   :  { %v3191_v7 = vpop.f32.mrb[16].mxu0 }
 0x2b3   :  { %v761_v8 = vpop.f32.mrb[17].mxu0  ;;  %v2524_v9 = vpop.f32.mrb[16].mxu1 }
 0x2b4   :  { %v3193_v10 = vpop.f32.mrb[18].mxu0  ;;  %v872_v11 = vpop.f32.mrb[17].mxu1 }
 0x2b5   :  { %v765_v12 = vpop.f32.mrb[19].mxu0  ;;  %v2525_v13 = vpop.f32.mrb[18].mxu1 }
 0x2b6   :  { %v958_v14 = vpack.c.bf16 %v765_v12, %v761_v8  ;;  %v1144_v15 = vpack.c.bf16 %v2525_v13, %v2524_v9  ;;  %v875_v16 = vpop.f32.mrb[19].mxu1  ;;  %v2837_v8 = vld [vmem:[%s3590_s9 + $0x50] ss:$12 sps:$4 sm:$0xff]   ;;  %v2841_v12 = vld [vmem:[%s3590_s9 + $0x68] ss:$12 sps:$4 sm:$0xff]  }
 0x2b7   :  { %v1143_v17 = vpack.c.bf16 %v875_v16, %v872_v11 }
 0x2b8   :  { %2538 = vmatprep.subr.bf16.mxu1 %v958_v14 }
 0x2b9   :  { %2539 = vmatpush3.bf16.msra.mxu1 %v958_v14  ;;  %2570 = vmatprep.subr.bf16.mxu0 %v1143_v17 }
 0x2ba   :  { %v3195_v18 = vpop.f32.mrb[20].mxu0  ;;  %2571 = vmatpush3.bf16.msra.mxu0 %v1143_v17  ;;  %v3266_v17 = vld [vmem:[%s3582_s1 + $0x70] sm:$0xff]  }
 0x2bb   :  { %v771_v19 = vpop.f32.mrb[21].mxu0  ;;  %v2528_v20 = vpop.f32.mrb[20].mxu1  ;;  %2572 = vmatprep.subr.bf16.mxu0 %v1144_v15 }
 0x2bc   :  { %v3197_v21 = vpop.f32.mrb[22].mxu0  ;;  %v888_v22 = vpop.f32.mrb[21].mxu1 }
 0x2bd   :  { %v775_v23 = vpop.f32.mrb[23].mxu0  ;;  %v2529_v24 = vpop.f32.mrb[22].mxu1 }
 0x2be   :  { %v959_v25 = vpack.c.bf16 %v775_v23, %v771_v19  ;;  %v1146_v26 = vpack.c.bf16 %v2529_v24, %v2528_v20  ;;  %v891_v27 = vpop.f32.mrb[23].mxu1  ;;  %2573 = vmatpush3.bf16.msra.mxu0 %v1144_v15  ;;  %v3261_v15 = vld [vmem:[%s3582_s1 + $0x68] sm:$0xff]   ;;  %v3277_v24 = vld [vmem:[%s3582_s1 + $0x78] sm:$0xff]  }
 0x2bf   :  { %v1145_v28 = vpack.c.bf16 %v891_v27, %v888_v22  ;;  %v3285_v27 = vld [vmem:[%s3582_s1 + $0x8] sm:$0xff]  }
 0x2c0   :  { %2540 = vmatprep.subr.bf16.mxu1 %v959_v25 }
 0x2c1   :  { %2541 = vmatpush3.bf16.msra.mxu1 %v959_v25  ;;  %2574 = vmatprep.subr.bf16.mxu0 %v1145_v28 }
 0x2c2   :  { %v3199_v29 = vpop.f32.mrb[24].mxu0  ;;  %2575 = vmatpush3.bf16.msra.mxu0 %v1145_v28  ;;  %v3290_v28 = vld [vmem:[%s3582_s1 + $0x10] sm:$0xff]  }
 0x2c3   :  { %v781_v30 = vpop.f32.mrb[25].mxu0  ;;  %v2532_v31 = vpop.f32.mrb[24].mxu1  ;;  %2576 = vmatprep.subr.bf16.mxu0 %v1146_v26 }
 0x2c4   :  { %v3201_v32 = vpop.f32.mrb[26].mxu0  ;;  %v904_v33 = vpop.f32.mrb[25].mxu1 }
 0x2c5   :  { %v785_v34 = vpop.f32.mrb[27].mxu0  ;;  %v2533_v35 = vpop.f32.mrb[26].mxu1 }
 0x2c6   :  { %v960_v36 = vpack.c.bf16 %v785_v34, %v781_v30  ;;  %v1148_v38 = vpack.c.bf16 %v2533_v35, %v2532_v31  ;;  %v907_v39 = vpop.f32.mrb[27].mxu1  ;;  %2577 = vmatpush3.bf16.msra.mxu0 %v1146_v26  ;;  %v2824_v26 = vld [vmem:[%s3590_s9 + $0x4] ss:$12 sps:$4 sm:$0xff]   ;;  %v2822_v30 = vld [vmem:[%s3590_s9] ss:$12 sps:$4 sm:$0xff]   ;;  %v3310_v35 = vld [vmem:[%s3582_s1 + $0x18] sm:$0xff]  }
 0x2c7   :  { %v1147_v40 = vpack.c.bf16 %v907_v39, %v904_v33  ;;  %v2828_v31 = vld [vmem:[%s3590_s9 + $0x1c] ss:$12 sps:$4 sm:$0xff]   ;;  %v2826_v33 = vld [vmem:[%s3590_s9 + $0x18] ss:$12 sps:$4 sm:$0xff]   ;;  %v2832_v34 = vld [vmem:[%s3590_s9 + $0x34] ss:$12 sps:$4 sm:$0xff]  }
 0x2c8   :  { %2542 = vmatprep.subr.bf16.mxu1 %v960_v36  ;;  %v2836_v39 = vld [vmem:[%s3590_s9 + $0x4c] ss:$12 sps:$4 sm:$0xff]  }
 0x2c9   :  { %2543 = vmatpush3.bf16.msra.mxu1 %v960_v36  ;;  %2578 = vmatprep.subr.bf16.mxu0 %v1147_v40  ;;  %v3315_v36 = vld [vmem:[%s3582_s1 + $0x20] sm:$0xff]  }
 0x2ca   :  { %v3203_v41 = vpop.f32.mrb[28].mxu0  ;;  %2579 = vmatpush3.bf16.msra.mxu0 %v1147_v40  ;;  %v2834_v40 = vld [vmem:[%s3590_s9 + $0x48] ss:$12 sps:$4 sm:$0xff]  }
 0x2cb   :  { %v791_v42 = vpop.f32.mrb[29].mxu0  ;;  %2580 = vmatprep.subr.bf16.mxu0 %v1148_v38  ;;  %v2536_v43 = vpop.f32.mrb[28].mxu1 }
 0x2cc   :  { %v3205_v44 = vpop.f32.mrb[30].mxu0  ;;  %v920_v45 = vpop.f32.mrb[29].mxu1 }
 0x2cd   :  { %v795_v46 = vpop.f32.mrb[31].mxu0  ;;  %v2537_v47 = vpop.f32.mrb[30].mxu1 }
 0x2ce   :  { %v961_v48 = vpack.c.bf16 %v795_v46, %v791_v42  ;;  %2581 = vmatpush3.bf16.msra.mxu0 %v1148_v38  ;;  %v1150_v49 = vpack.c.bf16 %v2537_v47, %v2536_v43  ;;  %v923_v50 = vpop.f32.mrb[31].mxu1  ;;  %v2830_v38 = vld [vmem:[%s3590_s9 + $0x30] ss:$12 sps:$4 sm:$0xff]   ;;  %v3334_v43 = vld [vmem:[%s3582_s1 + $0x28] sm:$0xff]  }
 0x2cf   :  { %v1149_v51 = vpack.c.bf16 %v923_v50, %v920_v45  ;;  %v2840_v42 = vld [vmem:[%s3590_s9 + $0x64] ss:$12 sps:$4 sm:$0xff]   ;;  %v2838_v46 = vld [vmem:[%s3590_s9 + $0x60] ss:$12 sps:$4 sm:$0xff]   ;;  %v2844_v47 = vld [vmem:[%s3590_s9 + $0x7c] ss:$12 sps:$4 sm:$0xff]  }
 0x2d0   :  { %2544 = vmatprep.subr.bf16.mxu1 %v961_v48  ;;  %v3339_v45 = vld [vmem:[%s3582_s1 + $0x30] sm:$0xff]   ;;  %v2845_v50 = vld [vmem:[%s3590_s9 + $0x80] ss:$12 sps:$4 sm:$0xff]  }
 0x2d1   :  { %2545 = vmatpush3.bf16.msra.mxu1 %v961_v48  ;;  %2582 = vmatprep.subr.bf16.mxu0 %v1149_v51  ;;  %v2842_v48 = vld [vmem:[%s3590_s9 + $0x78] ss:$12 sps:$4 sm:$0xff]  }
 0x2d2   :  { %v3207_v37 = vpop.f32.mrb[32].mxu0  ;;  %2583 = vmatpush3.bf16.msra.mxu0 %v1149_v51  ;;  %v2848_v51 = vld [vmem:[%s3590_s9 + $0x94] ss:$12 sps:$4 sm:$0xff]  }
 0x2d3   :  { %v801_v52 = vpop.f32.mrb[33].mxu0  ;;  %2584 = vmatprep.subr.bf16.mxu0 %v1150_v49 }
 0x2d4   :  { %v3212_v54 = vpop.f32.mrb[34].mxu0 }
 0x2d5   :  { %v805_v55 = vpop.f32.mrb[35].mxu0 }
 0x2d6   :  { %v962_v59 = vpack.c.bf16 %v805_v55, %v801_v52  ;;  %2585 = vmatpush3.bf16.msra.mxu0 %v1150_v49  ;;  %v3355_v49 = vld [vmem:[%s3582_s1 + $0x38] sm:$0xff]  }
 0x2d7   :  { %2602 = vmatprep.subr.bf16.mxu0 %v2825_v53  ;;  %3598 = vst [vmem:[#allocation5_spill] sm:$0xff] %v3355_v49  ;;  %v2846_v52 = vld [vmem:[%s3590_s9 + $0x90] ss:$12 sps:$4 sm:$0xff]   ;;  %v2852_v55 = vld [vmem:[%s3590_s9 + $0xac] ss:$12 sps:$4 sm:$0xff]  }
 0x2d8   :  { %2546 = vmatprep.subr.bf16.mxu1 %v962_v59 }
 0x2d9   :  { %2547 = vmatpush3.bf16.msra.mxu1 %v962_v59  ;;  %2587 = vmatmul.mubr.bf16.vlgmr.msra.gmra.mrb[48].mxu0 %v3217_v56  ;;  %v2850_v59 = vld [vmem:[%s3590_s9 + $0xa8] ss:$12 sps:$4 sm:$0xff]  }
 0x2da   :  { %v3228_v63 = vpop.f32.mrb[36].mxu0  ;;  %2590 = vmatprep.mubr.bf16.mxu0 %v3222_v61  ;;  %2603 = vmatpush3.bf16.msra.mxu0 %v2825_v53  ;;  %v2849_v53 = vld [vmem:[%s3590_s9 + $0x98] ss:$12 sps:$4 sm:$0xff]  }
 0x2db   :  { %v811_v0 = vpop.f32.mrb[37].mxu0  ;;  %2604 = vmatprep.subr.bf16.mxu0 %v2829_v62 }
 0x2dc   :  { %v3234_v2 = vpop.f32.mrb[38].mxu0 }
 0x2dd   :  { %v815_v3 = vpop.f32.mrb[39].mxu0 }
 0x2de   :  { %v963_v5 = vpack.c.bf16 %v815_v3, %v811_v0  ;;  %2605 = vmatpush3.bf16.msra.mxu0 %v2829_v62  ;;  %v2853_v62 = vld [vmem:[%s3590_s9 + $0xb0] ss:$12 sps:$4 sm:$0xff]  }
 0x2df   :  { %2606 = vmatprep.subr.bf16.mxu0 %v2833_v1 }
 0x2e0   :  { %2548 = vmatprep.subr.bf16.mxu1 %v963_v5 }
 0x2e1   :  { %2549 = vmatpush3.bf16.msra.mxu1 %v963_v5  ;;  %2591 = vmatmul.mubr.bf16.gmra.mrb[52].mxu0 %v3239_v4 }
 0x2e2   :  { %v3250_v9 = vpop.f32.mrb[40].mxu0  ;;  %2594 = vmatprep.mubr.bf16.mxu0 %v3244_v6  ;;  %2607 = vmatpush3.bf16.msra.mxu0 %v2833_v1 }
 0x2e3   :  { %v821_v11 = vpop.f32.mrb[41].mxu0  ;;  %2608 = vmatprep.subr.bf16.mxu0 %v2837_v8 }
 0x2e4   :  { %v3256_v13 = vpop.f32.mrb[42].mxu0 }
 0x2e5   :  { %v825_v14 = vpop.f32.mrb[43].mxu0 }
 0x2e6   :  { %v964_v16 = vpack.c.bf16 %v825_v14, %v821_v11  ;;  %2609 = vmatpush3.bf16.msra.mxu0 %v2837_v8 }
 0x2e7   :  { %2610 = vmatprep.subr.bf16.mxu0 %v2841_v12 }
 0x2e8   :  { %2550 = vmatprep.subr.bf16.mxu1 %v964_v16 }
 0x2e9   :  { %2551 = vmatpush3.bf16.msra.mxu1 %v964_v16  ;;  %2595 = vmatmul.mubr.bf16.gmra.mrb[56].mxu0 %v3261_v15 }
 0x2ea   :  { %v3269_v19 = vpop.f32.mrb[44].mxu0  ;;  %2598 = vmatprep.mubr.bf16.mxu0 %v3266_v17  ;;  %2611 = vmatpush3.bf16.msra.mxu0 %v2841_v12 }
 0x2eb   :  { %v831_v20 = vpop.f32.mrb[45].mxu0  ;;  %2612 = vmatprep.subr.bf16.mxu0 %v2845_v50 }
 0x2ec   :  { %v3272_v22 = vpop.f32.mrb[46].mxu0 }
 0x2ed   :  { %v835_v23 = vpop.f32.mrb[47].mxu0 }
 0x2ee   :  { %v965_v25 = vpack.c.bf16 %v835_v23, %v831_v20  ;;  %2613 = vmatpush3.bf16.msra.mxu0 %v2845_v50 }
 0x2ef   :  { %2614 = vmatprep.subr.bf16.mxu0 %v2849_v53 }
 0x2f0   :  { %2552 = vmatprep.subr.bf16.mxu1 %v965_v25 }
 0x2f1   :  { %2553 = vmatpush3.bf16.msra.mxu1 %v965_v25  ;;  %2599 = vmatmul.mubr.bf16.gmra.mrb[60].mxu0 %v3277_v24 }
 0x2f2   :  { %1497 = vmatprep.subr.bf16.mxu1 %v2824_v26  ;;  %2615 = vmatpush3.bf16.msra.mxu0 %v2849_v53  ;;  %v3389_v26 = vld [vmem:[%s3589_s8] ss:$0 sm:$0xff] }
 0x2f3   :  { %2616 = vmatprep.subr.bf16.mxu0 %v2853_v62 }
 0x2f4   :  { %2555 = vmatmul.mubr.bf16.vlgmr.msra.gmra.mrb[32].mxu1 %v3285_v27 }
 0x2f5   :  { %2558 = vmatprep.mubr.bf16.mxu1 %v3290_v28  ;;  %1498 = vmatpush1.bf16.msra.mxu1 %v2822_v30 }
 0x2f6   :  { %1499 = vmatprep.subr.bf16.mxu1 %v2828_v31  ;;  %2617 = vmatpush3.bf16.msra.mxu0 %v2853_v62 }
 0x2f9   :  { %1500 = vmatpush1.bf16.msra.mxu1 %v2826_v33  ;;  %v944_v33 = vadd.f32 %v3389_v26, %v3195_v18 }
 0x2fa   :  { %1501 = vmatprep.subr.bf16.mxu1 %v2832_v34 }
 0x2fc   :  { %2559 = vmatmul.mubr.bf16.gmra.mrb[36].mxu1 %v3310_v35 }
 0x2fd   :  { %2562 = vmatprep.mubr.bf16.mxu1 %v3315_v36  ;;  %1502 = vmatpush1.bf16.msra.mxu1 %v2830_v38  ;;  %v942_v38 = vadd.f32 %v3389_v26, %v3191_v7 }
 0x2fe   :  { %1503 = vmatprep.subr.bf16.mxu1 %v2836_v39 }
 0x301   :  { %1504 = vmatpush1.bf16.msra.mxu1 %v2834_v40 }
 0x302   :  { %1505 = vmatprep.subr.bf16.mxu1 %v2840_v42  ;;  %v945_v42 = vadd.f32 %v3389_v26, %v3197_v21  ;;  %v946_v21 = vadd.f32 %v3389_v26, %v3199_v29 }
 0x304   :  { %2563 = vmatmul.mubr.bf16.gmra.mrb[40].mxu1 %v3334_v43 }
 0x305   :  { %2566 = vmatprep.mubr.bf16.mxu1 %v3339_v45  ;;  %1506 = vmatpush1.bf16.msra.mxu1 %v2838_v46 }
 0x306   :  { %1507 = vmatprep.subr.bf16.mxu1 %v2844_v47 }
 0x309   :  { %1508 = vmatpush1.bf16.msra.mxu1 %v2842_v48  ;;  %v943_v48 = vadd.f32 %v3389_v26, %v3193_v10  ;;  %v949_v10 = vadd.f32 %v3389_v26, %v3205_v44 }
 0x30a   :  { %1509 = vmatprep.subr.bf16.mxu1 %v2848_v51 }
 0x30c   :  { %2567 = vmatmul.mubr.bf16.gmra.mrb[44].mxu1 %v3355_v49 }
 0x30d   :  { %1529 = vmatprep.mubr.bf16.mxu1 %v3595_v57  ;;  %1510 = vmatpush1.bf16.msra.mxu1 %v2846_v52  ;;  %v948_v57 = vadd.f32 %v3389_v26, %v3203_v41 }
 0x30e   :  { %1511 = vmatprep.subr.bf16.mxu1 %v2852_v55 }
 0x311   :  { %1512 = vmatpush1.bf16.msra.mxu1 %v2850_v59 }
 0x3ac   :  { %v2588_v0 = vpop.f32.mrb[48].mxu0 }
 0x3ad   :  { %v1250_v1 = vpop.f32.mrb[49].mxu0 }
 0x3ae   :  { %v2589_v3 = vpop.f32.mrb[50].mxu0 }
 0x3af   :  { %v1253_v5 = vpop.f32.mrb[51].mxu0 }
 0x3b4   :  { %v2592_v8 = vpop.f32.mrb[52].mxu0 }
 0x3b5   :  { %v1266_v11 = vpop.f32.mrb[53].mxu0 }
 0x3b6   :  { %v2593_v12 = vpop.f32.mrb[54].mxu0 }
 0x3b7   :  { %v1269_v14 = vpop.f32.mrb[55].mxu0 }
 0x3bc   :  { %v2596_v16 = vpop.f32.mrb[56].mxu0 }
 0x3bd   :  { %v3380_v20 = vpop.f32.mrb[57].mxu0 }
 0x3be   :  { %v3382_v23 = vpop.f32.mrb[58].mxu0 }
 0x3bf   :  { %v3384_v25 = vpop.f32.mrb[59].mxu0 }
 0x3c4   :  { %v3391_v30 = vpop.f32.mrb[60].mxu0 }
 0x3c5   :  { %v3393_v31 = vpop.f32.mrb[61].mxu0 }
 0x3c6   :  { %v3397_v34 = vpop.f32.mrb[62].mxu0 }
 0x3c7   :  { %v2556_v39 = vpop.f32.mrb[32].mxu1  ;;  %v3401_v40 = vpop.f32.mrb[63].mxu0 }
 0x3c8   :  { %v1129_v46 = vadd.f32 %v2556_v39, %v944_v33  ;;  %v1064_v47 = vpop.f32.mrb[33].mxu1 }
 0x3c9   :  { %v1127_v50 = vadd.f32 %v1064_v47, %v942_v38  ;;  %v2557_v51 = vpop.f32.mrb[34].mxu1  ;;  %v3599_v47 = vmov 0  }
 0x3ca   :  { %v1315_v52 = vadd.f32 %v2588_v0, %v1129_v46  ;;  %v1130_v18 = vadd.f32 %v2557_v51, %v945_v42  ;;  %v1067_v53 = vpop.f32.mrb[35].mxu1 }
 0x3cb   :  { %v1313_v55 = vadd.f32 %v1250_v1, %v1127_v50  ;;  %v1128_v59 = vadd.f32 %v1067_v53, %v943_v48  ;;  %v947_v1 = vadd.f32 %v3389_v26, %v3201_v32  ;;  %v950_v32 = vadd.f32 %v3389_v26, %v3207_v37 }
 0x3cc   :  { %v1316_v62 = vadd.f32 %v2589_v3, %v1130_v18 }
 0x3cd   :  { %v1314_v7 = vadd.f32 %v1253_v5, %v1128_v59  ;;  %v951_v59 = vadd.f32 %v3389_v26, %v3212_v54  ;;  %v956_v54 = vadd.f32 %v3389_v26, %v3269_v19 }
 0x3ce   :  { %v1330_v49 = vpack.c.bf16 %v1316_v62, %v1315_v52 }
 0x3cf   :  { %v1329_v33 = vpack.c.bf16 %v1314_v7, %v1313_v55  ;;  %v2560_v39 = vpop.f32.mrb[36].mxu1 }
 0x3d0   :  { %v1133_v38 = vadd.f32 %v2560_v39, %v948_v57  ;;  %v1080_v0 = vpop.f32.mrb[37].mxu1  ;;  %v952_v57 = vadd.f32 %v3389_v26, %v3228_v63 }
 0x3d1   :  { %v1131_v42 = vadd.f32 %v1080_v0, %v946_v21  ;;  %v2561_v3 = vpop.f32.mrb[38].mxu1  ;;  %1530 = vmatmul.mubr.bf16.vlgmr.msra.gmra.mrb[48].mxu1 %v1329_v33  ;;  %2618 = vmatprep.mubr.bf16.mxu0 %v1329_v33 }
 0x3d2   :  { %v1134_v5 = vadd.f32 %v2561_v3, %v949_v10  ;;  %v1319_v41 = vadd.f32 %v2592_v8, %v1133_v38  ;;  %v1083_v46 = vpop.f32.mrb[39].mxu1  ;;  %2619 = vmatmul.mubr.bf16.vlgmr.msra.gmra.mrb[64].mxu0 %v1330_v49  ;;  %1539 = vmatprep.mubr.bf16.mxu1 %v3599_v47  ;;  %v953_v8 = vadd.f32 %v3389_v26, %v3234_v2 }
 0x3d3   :  { %v1132_v29 = vadd.f32 %v1083_v46, %v947_v1  ;;  %v1317_v48 = vadd.f32 %v1266_v11, %v1131_v42  ;;  %v957_v10 = vadd.f32 %v3389_v26, %v3272_v22 }
 0x3d4   :  { %v1320_v50 = vadd.f32 %v2593_v12, %v1134_v5 }
 0x3d5   :  { %v1318_v51 = vadd.f32 %v1269_v14, %v1132_v29 }
 0x3d6   :  { %v1332_v44 = vpack.c.bf16 %v1320_v50, %v1319_v41 }
 0x3d7   :  { %v1331_v52 = vpack.c.bf16 %v1318_v51, %v1317_v48  ;;  %v2564_v18 = vpop.f32.mrb[40].mxu1 }
 0x3d8   :  { %v1137_v53 = vadd.f32 %v2564_v18, %v952_v57  ;;  %v1096_v55 = vpop.f32.mrb[41].mxu1 }
 0x3d9   :  { %v1135_v11 = vadd.f32 %v1096_v55, %v950_v32  ;;  %v2565_v12 = vpop.f32.mrb[42].mxu1  ;;  %1540 = vmatmul.mubr.bf16.gmra.mrb[52].mxu1 %v1330_v49  ;;  %2622 = vmatprep.mubr.bf16.mxu0 %v1331_v52  ;;  %v954_v49 = vadd.f32 %v3389_v26, %v3250_v9 }
 0x3da   :  { %v1138_v14 = vadd.f32 %v2565_v12, %v953_v8  ;;  %v1323_v63 = vadd.f32 %v2596_v16, %v1137_v53  ;;  %v1099_v62 = vpop.f32.mrb[43].mxu1  ;;  %2623 = vmatmul.mubr.bf16.gmra.mrb[68].mxu0 %v1332_v44  ;;  %1549 = vmatprep.mubr.bf16.mxu1 %v3599_v47 }
 0x3db   :  { %v1136_v37 = vadd.f32 %v1099_v62, %v951_v59  ;;  %v1321_v7 = vadd.f32 %v3380_v20, %v1135_v11  ;;  %v955_v20 = vadd.f32 %v3389_v26, %v3256_v13 }
 0x3dc   :  { %v1324_v2 = vadd.f32 %v3382_v23, %v1138_v14 }
 0x3dd   :  { %v1322_v21 = vadd.f32 %v3384_v25, %v1136_v37 }
 0x3de   :  { %v1334_v33 = vpack.c.bf16 %v1324_v2, %v1323_v63 }
 0x3df   :  { %v1333_v39 = vpack.c.bf16 %v1322_v21, %v1321_v7  ;;  %v2568_v16 = vpop.f32.mrb[44].mxu1 }
 0x3e0   :  { %v1141_v38 = vadd.f32 %v2568_v16, %v956_v54  ;;  %v1112_v0 = vpop.f32.mrb[45].mxu1 }
 0x3e1   :  { %v1139_v23 = vadd.f32 %v1112_v0, %v954_v49  ;;  %v2569_v1 = vpop.f32.mrb[46].mxu1  ;;  %1550 = vmatmul.mubr.bf16.gmra.mrb[56].mxu1 %v1331_v52  ;;  %2626 = vmatprep.mubr.bf16.mxu0 %v1333_v39 }
 0x3e2   :  { %v1142_v25 = vadd.f32 %v2569_v1, %v957_v10  ;;  %v1327_v19 = vadd.f32 %v3391_v30, %v1141_v38  ;;  %v1115_v42 = vpop.f32.mrb[47].mxu1  ;;  %2627 = vmatmul.mubr.bf16.gmra.mrb[72].mxu0 %v1334_v33  ;;  %1559 = vmatprep.mubr.bf16.mxu1 %v3599_v47 }
 0x3e3   :  { %v1140_v9 = vadd.f32 %v1115_v42, %v955_v20  ;;  %v1325_v3 = vadd.f32 %v3393_v31, %v1139_v23 }
 0x3e4   :  { %v1328_v22 = vadd.f32 %v3397_v34, %v1142_v25 }
 0x3e5   :  { %v1326_v5 = vadd.f32 %v3401_v40, %v1140_v9 }
 0x3e6   :  { %v1336_v41 = vpack.c.bf16 %v1328_v22, %v1327_v19 }
 0x3e7   :  { %v1335_v13 = vpack.c.bf16 %v1326_v5, %v1325_v3  ;;  %v2854_v5 = vld [vmem:[%s3592_s11] sm:$0xff]  }
 0x3e9   :  { %1560 = vmatmul.mubr.bf16.gmra.mrb[60].mxu1 %v1332_v44  ;;  %2630 = vmatprep.mubr.bf16.mxu0 %v1335_v13 }
 0x3ea   :  { %2631 = vmatmul.mubr.bf16.gmra.mrb[76].mxu0 %v1336_v41  ;;  %1569 = vmatprep.mubr.bf16.mxu1 %v3599_v47 }
 0x3eb   :  { %2650 = vmatprep.mubr.bf16.mxu0 %v3187_v60 }
 0x3f1   :  { %1570 = vmatmul.mubr.bf16.gmra.mrb[64].mxu1 %v1333_v39 }
 0x3f2   :  { %1579 = vmatprep.mubr.bf16.mxu1 %v3599_v47 }
 0x3f9   :  { %1580 = vmatmul.mubr.bf16.gmra.mrb[68].mxu1 %v1334_v33 }
 0x3fa   :  { %1589 = vmatprep.mubr.bf16.mxu1 %v3599_v47 }
 0x401   :  { %1590 = vmatmul.mubr.bf16.gmra.mrb[72].mxu1 %v1335_v13  ;;  %v2855_v13 = vld [vmem:[%s3592_s11 + $0x8] sm:$0xff]  }
 0x402   :  { %1599 = vmatprep.mubr.bf16.mxu1 %v3599_v47 }
 0x409   :  { %1600 = vmatmul.mubr.bf16.gmra.mrb[76].mxu1 %v1336_v41 }
 0x40a   :  { %2682 = vmatprep.mubr.bf16.mxu1 %v3182_v58 }
 0x4a4   :  { %v3447_v26 = vpop.f32.mrb[48].mxu1 }
 0x4a5   :  { %v1533_v30 = vpop.f32.mrb[49].mxu1  ;;  %v2620_v31 = vpop.f32.mrb[64].mxu0 }
 0x4a6   :  { %v3449_v34 = vpop.f32.mrb[50].mxu1  ;;  %v1644_v40 = vpop.f32.mrb[65].mxu0 }
 0x4a7   :  { %v1537_v60 = vpop.f32.mrb[51].mxu1  ;;  %v2621_v46 = vpop.f32.mrb[66].mxu0 }
 0x4a8   :  { %v1730_v29 = vpack.c.bf16 %v1537_v60, %v1533_v30  ;;  %v1852_v48 = vpack.c.bf16 %v2621_v46, %v2620_v31  ;;  %v1647_v50 = vpop.f32.mrb[67].mxu0  ;;  %v2856_v46 = vld [vmem:[%s3592_s11 + $0x10] sm:$0xff]  }
 0x4a9   :  { %v1851_v51 = vpack.c.bf16 %v1647_v50, %v1644_v40 }
 0x4aa   :  { %2634 = vmatprep.subr.bf16.mxu0 %v1730_v29 }
 0x4ab   :  { %2635 = vmatpush3.bf16.msra.mxu0 %v1730_v29  ;;  %2666 = vmatprep.subr.bf16.mxu1 %v1851_v51 }
 0x4ac   :  { %v3451_v47 = vpop.f32.mrb[52].mxu1  ;;  %2667 = vmatpush3.bf16.msra.mxu1 %v1851_v51 }
 0x4ad   :  { %v1543_v58 = vpop.f32.mrb[53].mxu1  ;;  %v2624_v57 = vpop.f32.mrb[68].mxu0  ;;  %2668 = vmatprep.subr.bf16.mxu1 %v1852_v48 }
 0x4ae   :  { %v3453_v44 = vpop.f32.mrb[54].mxu1  ;;  %v1660_v32 = vpop.f32.mrb[69].mxu0 }
 0x4af   :  { %v1547_v52 = vpop.f32.mrb[55].mxu1  ;;  %v2625_v18 = vpop.f32.mrb[70].mxu0 }
 0x4b0   :  { %v1731_v8 = vpack.c.bf16 %v1547_v52, %v1543_v58  ;;  %v1854_v53 = vpack.c.bf16 %v2625_v18, %v2624_v57  ;;  %v1663_v55 = vpop.f32.mrb[71].mxu0  ;;  %2669 = vmatpush3.bf16.msra.mxu1 %v1852_v48  ;;  %v2858_v58 = vld [vmem:[%s3592_s11 + $0x20] sm:$0xff]  }
 0x4b1   :  { %v1853_v59 = vpack.c.bf16 %v1663_v55, %v1660_v32 }
 0x4b2   :  { %2636 = vmatprep.subr.bf16.mxu0 %v1731_v8 }
 0x4b3   :  { %2637 = vmatpush3.bf16.msra.mxu0 %v1731_v8  ;;  %2670 = vmatprep.subr.bf16.mxu1 %v1853_v59 }
 0x4b4   :  { %v3455_v11 = vpop.f32.mrb[56].mxu1  ;;  %2671 = vmatpush3.bf16.msra.mxu1 %v1853_v59 }
 0x4b5   :  { %v1553_v12 = vpop.f32.mrb[57].mxu1  ;;  %v2628_v14 = vpop.f32.mrb[72].mxu0  ;;  %2672 = vmatprep.subr.bf16.mxu1 %v1854_v53 }
 0x4b6   :  { %v3457_v63 = vpop.f32.mrb[58].mxu1  ;;  %v1676_v62 = vpop.f32.mrb[73].mxu0 }
 0x4b7   :  { %v1557_v37 = vpop.f32.mrb[59].mxu1  ;;  %v2629_v7 = vpop.f32.mrb[74].mxu0 }
 0x4b8   :  { %v1732_v2 = vpack.c.bf16 %v1557_v37, %v1553_v12  ;;  %v1856_v21 = vpack.c.bf16 %v2629_v7, %v2628_v14  ;;  %v1679_v54 = vpop.f32.mrb[75].mxu0  ;;  %2673 = vmatpush3.bf16.msra.mxu1 %v1854_v53  ;;  %v3520_v37 = vld [vmem:[%s3591_s10] ss:$0 sm:$0xff] }
 0x4b9   :  { %v1855_v33 = vpack.c.bf16 %v1679_v54, %v1676_v62 }
 0x4ba   :  { %2638 = vmatprep.subr.bf16.mxu0 %v1732_v2 }
 0x4bb   :  { %2639 = vmatpush3.bf16.msra.mxu0 %v1732_v2  ;;  %2674 = vmatprep.subr.bf16.mxu1 %v1855_v33 }
 0x4bc   :  { %v3459_v49 = vpop.f32.mrb[60].mxu1  ;;  %2675 = vmatpush3.bf16.msra.mxu1 %v1855_v33  ;;  %v1714_v33 = vadd.f32 %v3520_v37, %v3447_v26 }
 0x4bd   :  { %v1563_v39 = vpop.f32.mrb[61].mxu1  ;;  %v2632_v16 = vpop.f32.mrb[76].mxu0  ;;  %2676 = vmatprep.subr.bf16.mxu1 %v1856_v21 }
 0x4be   :  { %v3461_v10 = vpop.f32.mrb[62].mxu1  ;;  %v1692_v38 = vpop.f32.mrb[77].mxu0 }
 0x4bf   :  { %v1567_v0 = vpop.f32.mrb[63].mxu1  ;;  %v2633_v20 = vpop.f32.mrb[78].mxu0 }
 0x4c0   :  { %v1733_v23 = vpack.c.bf16 %v1567_v0, %v1563_v39  ;;  %v1858_v1 = vpack.c.bf16 %v2633_v20, %v2632_v16  ;;  %v1695_v25 = vpop.f32.mrb[79].mxu0  ;;  %2677 = vmatpush3.bf16.msra.mxu1 %v1856_v21  ;;  %v1716_v21 = vadd.f32 %v3520_v37, %v3451_v47 }
 0x4c1   :  { %v1857_v19 = vpack.c.bf16 %v1695_v25, %v1692_v38  ;;  %v1717_v38 = vadd.f32 %v3520_v37, %v3453_v44  ;;  %v1718_v44 = vadd.f32 %v3520_v37, %v3455_v11 }
 0x4c2   :  { %2640 = vmatprep.subr.bf16.mxu0 %v1733_v23 }
 0x4c3   :  { %2641 = vmatpush3.bf16.msra.mxu0 %v1733_v23  ;;  %2678 = vmatprep.subr.bf16.mxu1 %v1857_v19  ;;  %v1715_v23 = vadd.f32 %v3520_v37, %v3449_v34  ;;  %v1721_v34 = vadd.f32 %v3520_v37, %v3461_v10 }
 0x4c4   :  { %v3463_v42 = vpop.f32.mrb[64].mxu1  ;;  %2679 = vmatpush3.bf16.msra.mxu1 %v1857_v19 }
 0x4c5   :  { %v1573_v9 = vpop.f32.mrb[65].mxu1  ;;  %2680 = vmatprep.subr.bf16.mxu1 %v1858_v1 }
 0x4c6   :  { %v3465_v3 = vpop.f32.mrb[66].mxu1 }
 0x4c7   :  { %v1577_v22 = vpop.f32.mrb[67].mxu1 }
 0x4c8   :  { %v1734_v41 = vpack.c.bf16 %v1577_v22, %v1573_v9  ;;  %2681 = vmatpush3.bf16.msra.mxu1 %v1858_v1 }
 0x4c9   :  { %2730 = vmatprep.subr.bf16.mxu1 %v2854_v5 }
 0x4ca   :  { %2642 = vmatprep.subr.bf16.mxu0 %v1734_v41 }
 0x4cb   :  { %2643 = vmatpush3.bf16.msra.mxu0 %v1734_v41  ;;  %2683 = vmatmul.mubr.bf16.vlgmr.msra.gmra.mrb[80].mxu1 %v3217_v56  ;;  %v2857_v56 = vld [vmem:[%s3592_s11 + $0x18] sm:$0xff]  }
 0x4cc   :  { %v3474_v30 = vpop.f32.mrb[68].mxu1  ;;  %2686 = vmatprep.mubr.bf16.mxu1 %v3222_v61  ;;  %2738 = vmatpush3.bf16.msra.mxu1 %v2854_v5 }
 0x4cd   :  { %v1583_v31 = vpop.f32.mrb[69].mxu1  ;;  %2731 = vmatprep.subr.bf16.mxu1 %v2855_v13 }
 0x4ce   :  { %v3477_v40 = vpop.f32.mrb[70].mxu1 }
 0x4cf   :  { %v1587_v60 = vpop.f32.mrb[71].mxu1 }
 0x4d0   :  { %v1735_v29 = vpack.c.bf16 %v1587_v60, %v1583_v31  ;;  %2739 = vmatpush3.bf16.msra.mxu1 %v2855_v13 }
 0x4d1   :  { %2732 = vmatprep.subr.bf16.mxu1 %v2856_v46 }
 0x4d2   :  { %2644 = vmatprep.subr.bf16.mxu0 %v1735_v29 }
 0x4d3   :  { %2645 = vmatpush3.bf16.msra.mxu0 %v1735_v29  ;;  %2687 = vmatmul.mubr.bf16.gmra.mrb[84].mxu1 %v3239_v4  ;;  %v2859_v4 = vld [vmem:[%s3592_s11 + $0x28] sm:$0xff]  }
 0x4d4   :  { %v3486_v61 = vpop.f32.mrb[72].mxu1  ;;  %2690 = vmatprep.mubr.bf16.mxu1 %v3244_v6  ;;  %2740 = vmatpush3.bf16.msra.mxu1 %v2856_v46 }
 0x4d5   :  { %v1593_v48 = vpop.f32.mrb[73].mxu1  ;;  %2733 = vmatprep.subr.bf16.mxu1 %v2857_v56 }
 0x4d6   :  { %v3489_v50 = vpop.f32.mrb[74].mxu1 }
 0x4d7   :  { %v1597_v51 = vpop.f32.mrb[75].mxu1 }
 0x4d8   :  { %v1736_v57 = vpack.c.bf16 %v1597_v51, %v1593_v48  ;;  %2741 = vmatpush3.bf16.msra.mxu1 %v2857_v56  ;;  %v1719_v48 = vadd.f32 %v3520_v37, %v3457_v63 }
 0x4d9   :  { %2734 = vmatprep.subr.bf16.mxu1 %v2858_v58 }
 0x4da   :  { %2646 = vmatprep.subr.bf16.mxu0 %v1736_v57 }
 0x4db   :  { %2647 = vmatpush3.bf16.msra.mxu0 %v1736_v57  ;;  %2691 = vmatmul.mubr.bf16.gmra.mrb[88].mxu1 %v3261_v15  ;;  %v3600_v15 = vld [vmem:[#allocation5_spill] sm:$0xff] }
 0x4dc   :  { %v3498_v6 = vpop.f32.mrb[76].mxu1  ;;  %2694 = vmatprep.mubr.bf16.mxu1 %v3266_v17  ;;  %2742 = vmatpush3.bf16.msra.mxu1 %v2858_v58  ;;  %v2860_v17 = vld [vmem:[%s3592_s11 + $0x30] sm:$0xff]  }
 0x4dd   :  { %v1603_v32 = vpop.f32.mrb[77].mxu1  ;;  %2735 = vmatprep.subr.bf16.mxu1 %v2859_v4 }
 0x4de   :  { %v3501_v52 = vpop.f32.mrb[78].mxu1 }
 0x4df   :  { %v1607_v18 = vpop.f32.mrb[79].mxu1 }
 0x4e0   :  { %v1737_v8 = vpack.c.bf16 %v1607_v18, %v1603_v32  ;;  %2743 = vmatpush3.bf16.msra.mxu1 %v2859_v4 }
 0x4e1   :  { %2736 = vmatprep.subr.bf16.mxu1 %v2860_v17 }
 0x4e2   :  { %2648 = vmatprep.subr.bf16.mxu0 %v1737_v8 }
 0x4e3   :  { %2649 = vmatpush3.bf16.msra.mxu0 %v1737_v8  ;;  %2695 = vmatmul.mubr.bf16.gmra.mrb[92].mxu1 %v3277_v24  ;;  %v2861_v24 = vld [vmem:[%s3592_s11 + $0x38] sm:$0xff]  }
 0x4e4   :  { %2698 = vmatprep.subr.bf16.mxu0 %v2854_v5  ;;  %2744 = vmatpush3.bf16.msra.mxu1 %v2860_v17 }
 0x4e5   :  { %2737 = vmatprep.subr.bf16.mxu1 %v2861_v24 }
 0x4e6   :  { %2651 = vmatmul.mubr.bf16.vlgmr.msra.gmra.mrb[80].mxu0 %v3285_v27 }
 0x4e7   :  { %2654 = vmatprep.mubr.bf16.mxu0 %v3290_v28  ;;  %2699 = vmatpush3.bf16.msra.mxu0 %v2854_v5 }
 0x4e8   :  { %2700 = vmatprep.subr.bf16.mxu0 %v2855_v13  ;;  %2745 = vmatpush3.bf16.msra.mxu1 %v2861_v24 }
 0x4eb   :  { %2701 = vmatpush3.bf16.msra.mxu0 %v2855_v13  ;;  %v1720_v13 = vadd.f32 %v3520_v37, %v3459_v49 }
 0x4ec   :  { %2702 = vmatprep.subr.bf16.mxu0 %v2856_v46 }
 0x4ee   :  { %2655 = vmatmul.mubr.bf16.gmra.mrb[84].mxu0 %v3310_v35 }
 0x4ef   :  { %2658 = vmatprep.mubr.bf16.mxu0 %v3315_v36  ;;  %2703 = vmatpush3.bf16.msra.mxu0 %v2856_v46 }
 0x4f0   :  { %2704 = vmatprep.subr.bf16.mxu0 %v2857_v56 }
 0x4f3   :  { %2705 = vmatpush3.bf16.msra.mxu0 %v2857_v56 }
 0x4f4   :  { %2706 = vmatprep.subr.bf16.mxu0 %v2858_v58 }
 0x4f6   :  { %2659 = vmatmul.mubr.bf16.gmra.mrb[88].mxu0 %v3334_v43 }
 0x4f7   :  { %2662 = vmatprep.mubr.bf16.mxu0 %v3339_v45  ;;  %2707 = vmatpush3.bf16.msra.mxu0 %v2858_v58 }
 0x4f8   :  { %2708 = vmatprep.subr.bf16.mxu0 %v2859_v4 }
 0x4fb   :  { %2709 = vmatpush3.bf16.msra.mxu0 %v2859_v4 }
 0x4fc   :  { %2710 = vmatprep.subr.bf16.mxu0 %v2860_v17 }
 0x4fe   :  { %2663 = vmatmul.mubr.bf16.gmra.mrb[92].mxu0 %v3600_v15  ;;  %v1724_v15 = vadd.f32 %v3520_v37, %v3474_v30 }
 0x4ff   :  { %2711 = vmatpush3.bf16.msra.mxu0 %v2860_v17  ;;  %v1722_v17 = vadd.f32 %v3520_v37, %v3463_v42 }
 0x500   :  { %2712 = vmatprep.subr.bf16.mxu0 %v2861_v24 }
 0x503   :  { %2713 = vmatpush3.bf16.msra.mxu0 %v2861_v24 }
 0x59e   :  { %v2684_v27 = vpop.f32.mrb[80].mxu1 }
 0x59f   :  { %v1893_v28 = vpop.f32.mrb[81].mxu1 }
 0x5a0   :  { %v2685_v35 = vpop.f32.mrb[82].mxu1 }
 0x5a1   :  { %v1896_v36 = vpop.f32.mrb[83].mxu1 }
 0x5a6   :  { %v2688_v43 = vpop.f32.mrb[84].mxu1 }
 0x5a7   :  { %v1909_v45 = vpop.f32.mrb[85].mxu1 }
 0x5a8   :  { %v2689_v53 = vpop.f32.mrb[86].mxu1 }
 0x5a9   :  { %v1912_v55 = vpop.f32.mrb[87].mxu1 }
 0x5ae   :  { %v2692_v59 = vpop.f32.mrb[88].mxu1 }
 0x5af   :  { %v1925_v12 = vpop.f32.mrb[89].mxu1 }
 0x5b0   :  { %v2693_v14 = vpop.f32.mrb[90].mxu1 }
 0x5b1   :  { %v1928_v62 = vpop.f32.mrb[91].mxu1 }
 0x5b6   :  { %v3522_v7 = vpop.f32.mrb[92].mxu1 }
 0x5b7   :  { %v3524_v2 = vpop.f32.mrb[93].mxu1 }
 0x5b8   :  { %v3528_v54 = vpop.f32.mrb[94].mxu1 }
 0x5b9   :  { %v2652_v39 = vpop.f32.mrb[80].mxu0  ;;  %v3532_v16 = vpop.f32.mrb[95].mxu1 }
 0x5ba   :  { %v1837_v0 = vadd.f32 %v2652_v39, %v1716_v21  ;;  %v1772_v20 = vpop.f32.mrb[81].mxu0 }
 0x5bb   :  { %v1835_v1 = vadd.f32 %v1772_v20, %v1714_v33  ;;  %v2653_v25 = vpop.f32.mrb[82].mxu0 }
 0x5bc   :  { %v1838_v19 = vadd.f32 %v2653_v25, %v1717_v38  ;;  %v1958_v47 = vadd.f32 %v2684_v27, %v1837_v0  ;;  %v1775_v9 = vpop.f32.mrb[83].mxu0  ;;  %v1725_v27 = vadd.f32 %v3520_v37, %v3477_v40  ;;  %v1728_v38 = vadd.f32 %v3520_v37, %v3498_v6 }
 0x5bd   :  { %v1836_v22 = vadd.f32 %v1775_v9, %v1715_v23  ;;  %v1956_v5 = vadd.f32 %v1893_v28, %v1835_v1  ;;  %v1726_v0 = vadd.f32 %v3520_v37, %v3486_v61  ;;  %v1729_v23 = vadd.f32 %v3520_v37, %v3501_v52 }
 0x5be   :  { %v1959_v41 = vadd.f32 %v2685_v35, %v1838_v19  ;;  %v1727_v25 = vadd.f32 %v3520_v37, %v3489_v50  ;;  %v2289_v50 = vld [vmem:[%s3593_s12] ss:$0 sm:$0xff]  ;;  %s2887_s12 = smov [#allocation2]  }
 0x5bf   :  { %v1957_v26 = vadd.f32 %v1896_v36, %v1836_v22  ;;  %v1723_v36 = vadd.f32 %v3520_v37, %v3465_v3  ;;  %s2169_s5 = sshll.u32 %s2887_s12, 4  ;;  %s2170_s5 = int_to_ptr.vmem [resolvable:$true] %s2169_s5 }
 0x5c0   :  { %v1973_v31 = vpack.c.bf16 %v1959_v41, %v1958_v47  ;;  %s2862_s6 = scalar_lea.vmem %s2170_s5, 2048  ;;  %p2867_p1 = scmp.lt.s32.totalorder %s2170_s5, %s2170_s5 }
 0x5c1   :  { %v1972_v60 = vpack.c.bf16 %v1957_v26, %v1956_v5  ;;  %v2656_v46 = vpop.f32.mrb[84].mxu0  ;;  %p2863_p0 = scmp.ne.s32.totalorder %s2170_s5, %s2862_s6  ;;  %p2868_p2 = scmp.lt.s32.totalorder %s2862_s6, %s2862_s6 }
 0x5c2   :  { %v1841_v29 = vadd.f32 %v2656_v46, %v1720_v13  ;;  %v1788_v56 = vpop.f32.mrb[85].mxu0 }
 0x5c3   :  { %v1839_v51 = vadd.f32 %v1788_v56, %v1718_v44  ;;  %v2657_v58 = vpop.f32.mrb[86].mxu0  ;;  %2714 = vmatprep.mubr.bf16.mxu0 %v1972_v60  ;;  %p2869_p3 = por %p2868_p2, %p2867_p1 }
 0x5c4   :  { %v1842_v57 = vadd.f32 %v2657_v58, %v1721_v34  ;;  %v1962_v4 = vadd.f32 %v2688_v43, %v1841_v29  ;;  %v1791_v49 = vpop.f32.mrb[87].mxu0  ;;  %2715 = vmatmul.mubr.bf16.vlgmr.msra.gmra.mrb[96].mxu0 %v1973_v31 }
 0x5c5   :  { %v1840_v32 = vadd.f32 %v1791_v49, %v1719_v48  ;;  %v1960_v18 = vadd.f32 %v1909_v45, %v1839_v51  ;;  %p2870_p4 = pnand %p2869_p3, %p2863_p0 }
 0x5c6   :  { %v1963_v11 = vadd.f32 %v2689_v53, %v1842_v57 }
 0x5c7   :  { %v1961_v8 = vadd.f32 %v1912_v55, %v1840_v32 }
 0x5c8   :  { %v1975_v10 = vpack.c.bf16 %v1963_v11, %v1962_v4 }
 0x5c9   :  { %v1974_v24 = vpack.c.bf16 %v1961_v8, %v1960_v18  ;;  %v2660_v63 = vpop.f32.mrb[88].mxu0 }
 0x5ca   :  { %v1845_v28 = vadd.f32 %v2660_v63, %v1724_v15  ;;  %v1804_v35 = vpop.f32.mrb[89].mxu0 }
 0x5cb   :  { %v1843_v43 = vadd.f32 %v1804_v35, %v1722_v17  ;;  %v2661_v45 = vpop.f32.mrb[90].mxu0  ;;  %2718 = vmatprep.mubr.bf16.mxu0 %v1974_v24 }
 0x5cc   :  { %v1846_v53 = vadd.f32 %v2661_v45, %v1725_v27  ;;  %v1966_v55 = vadd.f32 %v2692_v59, %v1845_v28  ;;  %v1807_v30 = vpop.f32.mrb[91].mxu0  ;;  %2719 = vmatmul.mubr.bf16.gmra.mrb[100].mxu0 %v1975_v10 }
 0x5cd   :  { %v1844_v21 = vadd.f32 %v1807_v30, %v1723_v36  ;;  %v1964_v33 = vadd.f32 %v1925_v12, %v1843_v43 }
 0x5ce   :  { %v1967_v42 = vadd.f32 %v2693_v14, %v1846_v53 }
 0x5cf   :  { %v1965_v39 = vadd.f32 %v1928_v62, %v1844_v21 }
 0x5d0   :  { %v1977_v40 = vpack.c.bf16 %v1967_v42, %v1966_v55 }
 0x5d1   :  { %v1976_v20 = vpack.c.bf16 %v1965_v39, %v1964_v33  ;;  %v2664_v3 = vpop.f32.mrb[92].mxu0 }
 0x5d2   :  { %v1849_v1 = vadd.f32 %v2664_v3, %v1728_v38  ;;  %v1820_v59 = vpop.f32.mrb[93].mxu0 }
 0x5d3   :  { %v1847_v12 = vadd.f32 %v1820_v59, %v1726_v0  ;;  %v2665_v14 = vpop.f32.mrb[94].mxu0  ;;  %2722 = vmatprep.mubr.bf16.mxu1 %v1976_v20 }
 0x5d4   :  { %v1850_v62 = vadd.f32 %v2665_v14, %v1729_v23  ;;  %v1970_v6 = vadd.f32 %v3522_v7, %v1849_v1  ;;  %v1823_v19 = vpop.f32.mrb[95].mxu0  ;;  %2723 = vmatmul.mubr.bf16.vlgmr.msra.gmra.mrb[96].mxu1 %v1977_v40 }
 0x5d5   :  { %v1848_v47 = vadd.f32 %v1823_v19, %v1727_v25  ;;  %v1968_v61 = vadd.f32 %v3524_v2, %v1847_v12 }
 0x5d6   :  { %v1971_v9 = vadd.f32 %v3528_v54, %v1850_v62 }
 0x5d7   :  { %v1969_v52 = vadd.f32 %v3532_v16, %v1848_v47 }
 0x5d8   :  { %v1979_v22 = vpack.c.bf16 %v1971_v9, %v1970_v6 }
 0x5d9   :  { %v1978_v5 = vpack.c.bf16 %v1969_v52, %v1968_v61 }
 0x5db   :  { %2726 = vmatprep.mubr.bf16.mxu1 %v1978_v5 }
 0x5dc   :  { %2727 = vmatmul.mubr.bf16.gmra.mrb[100].mxu1 %v1979_v22 }
 0x697   :  { %v2716_v37 = vpop.f32.mrb[96].mxu0 }
 0x698   :  { %v2094_v41 = vadd.f32 %v2716_v37, %v2289_v50  ;;  %v2085_v7 = vpop.f32.mrb[97].mxu0 }
 0x699   :  { %v2086_v26 = vadd.f32 %v2289_v50, %v2085_v7  ;;  %v2717_v13 = vpop.f32.mrb[98].mxu0 }
 0x69a   :  { %2150 = vst [vmem:[#allocation2 + $0x10] sm:$0xff] %v2094_v41  ;;  %v2097_v31 = vadd.f32 %v2717_v13, %v2289_v50  ;;  %v2088_v2 = vpop.f32.mrb[99].mxu0 }
 0x69b   :  { %2148 = vst [vmem:[#allocation2] sm:$0xff] %v2086_v26  ;;  %v2089_v54 = vadd.f32 %v2289_v50, %v2088_v2 }
 0x69c   :  { %2151 = vst [vmem:[#allocation2 + $0x18] sm:$0xff] %v2097_v31 }
 0x69d   :  { %2149 = vst [vmem:[#allocation2 + $0x8] sm:$0xff] %v2089_v54 }
 0x69f   :  { %v2720_v16 = vpop.f32.mrb[100].mxu0 }
 0x6a0   :  { %v2110_v44 = vadd.f32 %v2720_v16, %v2289_v50  ;;  %v2101_v60 = vpop.f32.mrb[101].mxu0 }
 0x6a1   :  { %v2102_v46 = vadd.f32 %v2289_v50, %v2101_v60  ;;  %v2721_v34 = vpop.f32.mrb[102].mxu0 }
 0x6a2   :  { %2154 = vst [vmem:[#allocation2 + $0x30] sm:$0xff] %v2110_v44  ;;  %v2113_v29 = vadd.f32 %v2721_v34, %v2289_v50  ;;  %v2104_v56 = vpop.f32.mrb[103].mxu0 }
 0x6a3   :  { %2152 = vst [vmem:[#allocation2 + $0x20] sm:$0xff] %v2102_v46  ;;  %v2105_v48 = vadd.f32 %v2289_v50, %v2104_v56 }
 0x6a4   :  { %2155 = vst [vmem:[#allocation2 + $0x38] sm:$0xff] %v2113_v29 }
 0x6a5   :  { %2153 = vst [vmem:[#allocation2 + $0x28] sm:$0xff] %v2105_v48 }
 0x6a7   :  { %v2724_v51 = vpop.f32.mrb[96].mxu1 }
 0x6a8   :  { %v2126_v58 = vadd.f32 %v2724_v51, %v2289_v50  ;;  %v2117_v57 = vpop.f32.mrb[97].mxu1 }
 0x6a9   :  { %v2118_v4 = vadd.f32 %v2289_v50, %v2117_v57  ;;  %v2725_v49 = vpop.f32.mrb[98].mxu1 }
 0x6aa   :  { %2158 = vst [vmem:[#allocation2 + $0x50] sm:$0xff] %v2126_v58  ;;  %v2129_v32 = vadd.f32 %v2725_v49, %v2289_v50  ;;  %v2120_v18 = vpop.f32.mrb[99].mxu1 }
 0x6ab   :  { %2156 = vst [vmem:[#allocation2 + $0x40] sm:$0xff] %v2118_v4  ;;  %v2121_v11 = vadd.f32 %v2289_v50, %v2120_v18 }
 0x6ac   :  { %2159 = vst [vmem:[#allocation2 + $0x58] sm:$0xff] %v2129_v32 }
 0x6ad   :  { %2157 = vst [vmem:[#allocation2 + $0x48] sm:$0xff] %v2121_v11 }
 0x6af   :  { %v2728_v8 = vpop.f32.mrb[100].mxu1 }
 0x6b0   :  { %v2142_v15 = vadd.f32 %v2728_v8, %v2289_v50  ;;  %v2133_v10 = vpop.f32.mrb[101].mxu1 }
 0x6b1   :  { %v2134_v17 = vadd.f32 %v2289_v50, %v2133_v10  ;;  %v2729_v24 = vpop.f32.mrb[102].mxu1 }
 0x6b2   :  { %2162 = vst [vmem:[#allocation2 + $0x70] sm:$0xff] %v2142_v15  ;;  %v2145_v63 = vadd.f32 %v2729_v24, %v2289_v50  ;;  %v2136_v27 = vpop.f32.mrb[103].mxu1 }
 0x6b3   :  { %2160 = vst [vmem:[#allocation2 + $0x60] sm:$0xff] %v2134_v17  ;;  %v2137_v28 = vadd.f32 %v2289_v50, %v2136_v27 }
 0x6b4   :  { %2163 = vst [vmem:[#allocation2 + $0x78] sm:$0xff] %v2145_v63 }
 0x6b5   :  { %2161 = vst [vmem:[#allocation2 + $0x68] sm:$0xff] %v2137_v28 }
 0x6b6   :  { %2873 = shalt.err (!%p2870_p4)
}
 0x6b7   :  { %s2874_s14 = scalar_lea.hbm %s3594_s13, 2048 }
 0x6b8   :  { %p2875_p5 = scmp.ne.s32.totalorder %s3594_s13, %s2874_s14  ;;  %p2878_p6 = scmp.lt.u32.totalorder %s2874_s14, %s3594_s13 }
 0x6ba   :  { %p2880_p7 = pnand %p2878_p6, %p2875_p5 }
 0x6bc   :  { %2883 = shalt.err (!%p2880_p7)
}
 0x6bd   :  { %s2888_s8 = smov 128   ;;  %s2889_s18 = smov 8  }
 0x6be   :  { %2175 = dma.vmem_to_hbm [thread:$0]  %s2170_s5, 2048, %s3594_s13, [#allocation3], %s2888_s8, %s2888_s8, %s2889_s18  }
 0x6bf   :  { %2884 = dma.done.wait [#allocation3], 2048  }
 0x6c0   :  { %2885 = vsyncadd [#allocation3], 4294965248 }
 0x6c1   :  { %2179 = vsyncpa [#allocation3], 1 }

</bundles_post_ra>
